<compile_context>
chip_gen: v5e
topology: v5e:2x2
jax: 0.10.0
libtpu: 0.0.40
codegen_flags: <defaults>
</compile_context>

<pallas_src>
import functools

import jax
import jax.numpy as jnp
from jax.experimental import pallas as pl
from jax.experimental.pallas import tpu as pltpu

EPS = 1e-5
_TARGET_ROW_TILE = 1024   # rows per grid step for the 1x1 / elementwise passes


def _vmem_limit_bytes():
    """Scoped-VMEM budget: v5e/v6e have 128 MiB physical, v7x only 64 MiB."""
    try:
        kind = jax.devices()[0].device_kind.lower()
    except Exception:  # pragma: no cover - defensive
        kind = ""
    if "v5" in kind or "v6" in kind:
        return 64 * 1024 * 1024
    return 48 * 1024 * 1024          # safe headroom on v7x (64 MiB physical)


def _compiler_params():
    return pltpu.CompilerParams(
        # Every grid step writes disjoint output blocks -> shard across the
        # two TensorCores on v7x; harmless no-op on v5e/v6e.
        dimension_semantics=("parallel",),
        vmem_limit_bytes=_vmem_limit_bytes(),
    )


def _row_tile(rows, target=_TARGET_ROW_TILE):
    """Largest row tile <= target that divides `rows` (keeps BN stats exact)."""
    for t in (2048, 1024, 512, 256, 128, 64, 32, 16, 8):
        if t <= target and t <= rows and rows % t == 0:
            return t
    return rows


# ----------------------------- kernels ---------------------------------------
def _conv1_stats_kernel(x_ref, w_ref, y_ref, s1_ref, s2_ref, *, compute_dtype):
    """conv1x1: (rows x Cin) @ (Cin x width), plus BN1 partial sum / sum-sq."""
    y = jnp.dot(x_ref[...].astype(compute_dtype), w_ref[...],
                preferred_element_type=jnp.float32)
    y_ref[...] = y.astype(y_ref.dtype)
    s1_ref[0] = jnp.sum(y, axis=0, keepdims=True)
    s2_ref[0] = jnp.sum(y * y, axis=0, keepdims=True)


def _conv3x3_stats_kernel(y1_ref, w2_ref, sc_ref, sh_ref,
                          y2_ref, s1_ref, s2_ref,
                          halo_ref, patch_ref, *, H, W, compute_dtype):
    """bn1-apply + ReLU, VMEM-only zero halo, im2col patch matrix, one K=9*C
    MXU matmul; emits pre-BN conv2 output + BN2 partial stats."""
    C = y1_ref.shape[-1]

    # BN1 apply + ReLU in f32, downcast once for the MXU path.
    sc = sc_ref[...].reshape(1, 1, C)
    sh = sh_ref[...].reshape(1, 1, C)
    h = jnp.maximum(y1_ref[0].astype(jnp.float32) * sc + sh, 0.0)   # (H, W, C)

    # 1-px zero halo lives only in VMEM (no HBM pad round trip). Re-zeroed
    # every step so each TensorCore's private scratch is always valid.
    halo_ref[...] = jnp.zeros_like(halo_ref)
    halo_ref[1:H + 1, 1:W + 1, :] = h.astype(compute_dtype)

    # im2col in VMEM: 9 shifted views -> one (H*W, 9*C) patch matrix, so the
    # whole 3x3 conv is a single MXU matmul with K = 9*C.
    for dy in range(3):
        for dx in range(3):
            k = dy * 3 + dx
            patch_ref[:, k * C:(k + 1) * C] = (
                halo_ref[dy:dy + H, dx:dx + W, :].reshape(H * W, C))

    y2 = jnp.dot(patch_ref[...], w2_ref[...],
                 preferred_element_type=jnp.float32)                # (H*W, C)

    y2_ref[0] = y2.astype(y2_ref.dtype)
    s1_ref[0] = jnp.sum(y2, axis=0, keepdims=True)
    s2_ref[0] = jnp.sum(y2 * y2, axis=0, keepdims=True)


def _bn_relu_conv1_stats_kernel(y_ref, w_ref, sc_ref, sh_ref,
                                o_ref, s1_ref, s2_ref, *, compute_dtype):
    """bn2-apply + ReLU, conv3 (1x1); emits pre-BN output + BN3 partial stats."""
    h = jnp.maximum(y_ref[...].astype(jnp.float32) * sc_ref[...] + sh_ref[...],
                    0.0)
    y = jnp.dot(h.astype(compute_dtype), w_ref[...],
                preferred_element_type=jnp.float32)
    o_ref[...] = y.astype(o_ref.dtype)
    s1_ref[0] = jnp.sum(y, axis=0, keepdims=True)
    s2_ref[0] = jnp.sum(y * y, axis=0, keepdims=True)


def _bn_residual_relu_kernel(y_ref, id_ref, sc_ref, sh_ref, o_ref):
    """bn3-apply + residual add + ReLU (f32 VPU math, storage-dtype output)."""
    o_ref[...] = jnp.maximum(
        y_ref[...].astype(jnp.float32) * sc_ref[...] + sh_ref[...]
        + id_ref[...], 0.0).astype(o_ref.dtype)


# --------------------------- BN stats finalize --------------------------------
def _finalize_bn(sums, sqs, count, gamma, beta):
    """Reduce per-tile (sum, sum-sq) partials -> per-channel scale/shift."""
    s = jnp.sum(sums, axis=(0, 1))
    s2 = jnp.sum(sqs, axis=(0, 1))
    mean = s / count
    var = jnp.maximum(s2 / count - mean * mean, 0.0)      # biased (train) var
    scale = gamma * jax.lax.rsqrt(var + EPS)
    shift = beta - mean * scale
    return scale.reshape(1, -1), shift.reshape(1, -1)


# ------------------------------ wrapper ---------------------------------------
def bottleneck_forward(x_nchw, params, compute_dtype=jnp.bfloat16):
    """Bottleneck forward (stride=1, downsample=None). NCHW in / NCHW out.

    BatchNorm runs in training mode (batch stats, biased variance, eps=1e-5),
    matching a freshly built nn.BatchNorm2d. MXU matmuls use `compute_dtype`
    inputs (bf16 by default) with f32 accumulation; inter-pass activations are
    stored in `compute_dtype`; BN / residual math stays f32.
    """
    (w1, g1, b1, w2, g2, b2, w3, g3, b3) = params
    N, Cin, H, W = x_nchw.shape
    width = w1.shape[1]
    Cout = w3.shape[1]
    assert Cin == Cout, "downsample=None requires inplanes == planes*expansion"

    storage_dtype = compute_dtype           # f32 strict path keeps f32 storage
    rows = N * H * W
    tr = _row_tile(rows)
    nt = rows // tr
    cp = _compiler_params()

    # Pre-cast resident weights once (no per-step VALU re-cast, half the VMEM).
    w1_c = w1.astype(compute_dtype)                       # (Cin, width)
    w2_c = w2.reshape(9 * width, width).astype(compute_dtype)
    w3_c = w3.astype(compute_dtype)                       # (width, Cout)

    # TODO(synk): boundary NCHW<->NHWC transpose is left to XLA; an NHWC-native
    # surrounding model would feed (rows, C) directly and skip this copy.
    x_flat = jnp.transpose(x_nchw, (0, 2, 3, 1)).reshape(rows, Cin)

    # ---- pass 1: conv1 (1x1) + BN1 partial stats -----------------------------
    y1_flat, s1_sum, s1_sq = pl.pallas_call(
        functools.partial(_conv1_stats_kernel, compute_dtype=compute_dtype),
        out_shape=(jax.ShapeDtypeStruct((rows, width), storage_dtype),
                   jax.ShapeDtypeStruct((nt, 1, width), jnp.float32),
                   jax.ShapeDtypeStruct((nt, 1, width), jnp.float32)),
        grid=(nt,),
        in_specs=[pl.BlockSpec((tr, Cin), lambda i: (i, 0)),
                  pl.BlockSpec((Cin, width), lambda i: (0, 0))],   # resident
        out_specs=(pl.BlockSpec((tr, width), lambda i: (i, 0)),
                   pl.BlockSpec((1, 1, width), lambda i: (i, 0, 0)),
                   pl.BlockSpec((1, 1, width), lambda i: (i, 0, 0))),
        compiler_params=cp,
    )(x_flat, w1_c)
    sc1, sh1 = _finalize_bn(s1_sum, s1_sq, rows, g1, b1)

    # ---- pass 2: bn1+relu -> 3x3 conv (VMEM halo + one matmul) + BN2 stats ---
    # TODO(synk): for very large H*W*width stages, add a spatial stripe axis to
    # this grid (with 1-row stripe halos) to deepen the pipeline / cap VMEM.
    y1_img = y1_flat.reshape(N, H, W, width)              # free metadata change
    y2_img, s2_sum, s2_sq = pl.pallas_call(
        functools.partial(_conv3x3_stats_kernel, H=H, W=W,
                          compute_dtype=compute_dtype),
        out_shape=(jax.ShapeDtypeStruct((N, H * W, width), storage_dtype),
                   jax.ShapeDtypeStruct((N, 1, width), jnp.float32),
                   jax.ShapeDtypeStruct((N, 1, width), jnp.float32)),
        grid=(N,),
        in_specs=[pl.BlockSpec((1, H, W, width), lambda n: (n, 0, 0, 0)),
                  pl.BlockSpec((9 * width, width), lambda n: (0, 0)),  # resident
                  pl.BlockSpec((1, width), lambda n: (0, 0)),
                  pl.BlockSpec((1, width), lambda n: (0, 0))],
        out_specs=(pl.BlockSpec((1, H * W, width), lambda n: (n, 0, 0)),
                   pl.BlockSpec((1, 1, width), lambda n: (n, 0, 0)),
                   pl.BlockSpec((1, 1, width), lambda n: (n, 0, 0))),
        scratch_shapes=[pltpu.VMEM((H + 2, W + 2, width), compute_dtype),
                        pltpu.VMEM((H * W, 9 * width), compute_dtype)],
        compiler_params=cp,
    )(y1_img, w2_c, sc1, sh1)
    sc2, sh2 = _finalize_bn(s2_sum, s2_sq, rows, g2, b2)
    y2_flat = y2_img.reshape(rows, width)

    # ---- pass 3: bn2+relu -> conv3 (1x1) -> BN3 partial stats ----------------
    y3_flat, s3_sum, s3_sq = pl.pallas_call(
        functools.partial(_bn_relu_conv1_stats_kernel,
                          compute_dtype=compute_dtype),
        out_shape=(jax.ShapeDtypeStruct((rows, Cout), storage_dtype),
                   jax.ShapeDtypeStruct((nt, 1, Cout), jnp.float32),
                   jax.ShapeDtypeStruct((nt, 1, Cout), jnp.float32)),
        grid=(nt,),
        in_specs=[pl.BlockSpec((tr, width), lambda i: (i, 0)),
                  pl.BlockSpec((width, Cout), lambda i: (0, 0)),   # resident
                  pl.BlockSpec((1, width), lambda i: (0, 0)),
                  pl.BlockSpec((1, width), lambda i: (0, 0))],
        out_specs=(pl.BlockSpec((tr, Cout), lambda i: (i, 0)),
                   pl.BlockSpec((1, 1, Cout), lambda i: (i, 0, 0)),
                   pl.BlockSpec((1, 1, Cout), lambda i: (i, 0, 0))),
        compiler_params=cp,
    )(y2_flat, w3_c, sc2, sh2)
    sc3, sh3 = _finalize_bn(s3_sum, s3_sq, rows, g3, b3)

    # ---- pass 4: bn3 + residual + relu (output aliases y3's buffer) ----------
    out_flat = pl.pallas_call(
        _bn_residual_relu_kernel,
        out_shape=jax.ShapeDtypeStruct((rows, Cout), storage_dtype),
        grid=(nt,),
        in_specs=[pl.BlockSpec((tr, Cout), lambda i: (i, 0)),
                  pl.BlockSpec((tr, Cout), lambda i: (i, 0)),
                  pl.BlockSpec((1, Cout), lambda i: (0, 0)),
                  pl.BlockSpec((1, Cout), lambda i: (0, 0))],
        out_specs=pl.BlockSpec((tr, Cout), lambda i: (i, 0)),
        input_output_aliases={0: 0},
        compiler_params=cp,
    )(y3_flat, x_flat, sc3, sh3)

    # TODO(synk): eval-mode BN (running stats) would let the whole block fold
    # into 1-2 passes; train-mode stats force the 4-pass structure kept here.
    out = out_flat.reshape(N, H, W, Cout)
    return jnp.transpose(out, (0, 3, 1, 2))                # back to NCHW


# --------------------------- pure-JAX reference --------------------------------
def _reference(x_nchw, params):
    (w1, g1, b1, w2, g2, b2, w3, g3, b3) = params

    def bn(y, g, b):  # y is NCHW, train-mode batch stats, biased variance
        mean = y.mean(axis=(0, 2, 3), keepdims=True)
        var = ((y - mean) ** 2).mean(axis=(0, 2, 3), keepdims=True)
        return (y - mean) * jax.lax.rsqrt(var + EPS) * g.reshape(1, -1, 1, 1) \
            + b.reshape(1, -1, 1, 1)

    conv = lambda x, w, pad: jax.lax.conv_general_dilated(
        x, w, (1, 1), pad, dimension_numbers=("NCHW", "OIHW", "NCHW"))

    w1_oihw = jnp.transpose(w1, (1, 0))[:, :, None, None]
    w2_oihw = jnp.transpose(w2, (3, 2, 0, 1))
    w3_oihw = jnp.transpose(w3, (1, 0))[:, :, None, None]

    y = jax.nn.relu(bn(conv(x_nchw, w1_oihw, "VALID"), g1, b1))
    y = jax.nn.relu(bn(conv(y, w2_oihw, "SAME"), g2, b2))
    y = bn(conv(y, w3_oihw, "VALID"), g3, b3)
    return jax.nn.relu(y + x_nchw)


# ---------------------------------- main ----------------------------------------
if __name__ == "__main__":
    # Bottleneck(inplanes=16, planes=4): width=4, out channels = 16.
    N, H, W = 2, 8, 8
    inplanes, planes = 16, 4
    width = planes           # base_width=64, groups=1
    cout = planes * 4        # expansion

    key = jax.random.PRNGKey(0)
    ks = jax.random.split(key, 4)

    x = jax.random.normal(ks[0], (N, inplanes, H, W), dtype=jnp.float32)

    w1 = jax.random.normal(ks[1], (inplanes, width), jnp.float32) / jnp.sqrt(inplanes)
    w2 = jax.random.normal(ks[2], (3, 3, width, width), jnp.float32) / jnp.sqrt(9.0 * width)
    w3 = jax.random.normal(ks[3], (width, cout), jnp.float32) / jnp.sqrt(width)
    g1 = 1.0 + 0.1 * jnp.arange(width, dtype=jnp.float32)
    b1 = 0.01 * jnp.arange(width, dtype=jnp.float32)
    g2 = 1.0 - 0.05 * jnp.arange(width, dtype=jnp.float32)
    b2 = -0.02 * jnp.arange(width, dtype=jnp.float32)
    g3 = 1.0 + 0.03 * jnp.arange(cout, dtype=jnp.float32)
    b3 = 0.005 * jnp.arange(cout, dtype=jnp.float32)
    params = (w1, g1, b1, w2, g2, b2, w3, g3, b3)

    fwd = jax.jit(bottleneck_forward, static_argnums=(2,))

    ref = jax.block_until_ready(_reference(x, params))

    # Strict semantic check: f32 compute/storage path vs f32 reference.
    out_f32 = jax.block_until_ready(fwd(x, params, jnp.float32))
    assert out_f32.shape == (N, cout, H, W)
    err_f32 = float(jnp.max(jnp.abs(out_f32 - ref)))
    assert err_f32 < 1e-4, f"f32 mismatch vs reference: {err_f32}"

    # Performance path: bf16 MXU inputs and bf16 inter-pass storage
    # (f32 accumulation / BN math); bf16-level tolerance.
    out_bf16 = jax.block_until_ready(fwd(x, params, jnp.bfloat16))
    err_bf16 = float(jnp.max(jnp.abs(out_bf16.astype(jnp.float32) - ref)))
    assert err_bf16 < 2e-1, f"bf16 mismatch vs reference: {err_bf16}"

    print("KERNEL_OK")
</pallas_src>

<mosaic_0001>
module attributes {stable_mosaic.version = 11 : i64} {
  func.func @_conv1_stats_kernel(%arg0: i32, %arg1: memref<128x16xf32, #tpu.memory_space<vmem>>, %arg2: memref<16x4xf32, #tpu.memory_space<vmem>>, %arg3: memref<128x4xf32, #tpu.memory_space<vmem>>, %arg4: memref<1x1x4xf32, #tpu.memory_space<vmem>>, %arg5: memref<1x1x4xf32, #tpu.memory_space<vmem>>) attributes {dimension_semantics = [#tpu.dimension_semantics<parallel>], iteration_bounds = array<i64: 1>, scalar_prefetch = 0 : i64, scratch_operands = 0 : i64, tpu.core_type = #tpu.core_type<tc>, window_params = [{transform_indices = @transform_0, window_bounds = array<i64: 128, 16>}, {pipeline_mode = #tpu.pipeline_mode<synchronous>, transform_indices = @transform_1, window_bounds = array<i64: 16, 4>}, {transform_indices = @transform_2, window_bounds = array<i64: 128, 4>}, {transform_indices = @transform_3, window_bounds = array<i64: 1, 1, 4>}, {transform_indices = @transform_4, window_bounds = array<i64: 1, 1, 4>}]} {
    %c0 = arith.constant 0 : index
    %c0_0 = arith.constant 0 : index
    %0 = vector.load %arg1[%c0, %c0_0] : memref<128x16xf32, #tpu.memory_space<vmem>>, vector<128x16xf32>
    %c0_1 = arith.constant 0 : index
    %c0_2 = arith.constant 0 : index
    %1 = vector.load %arg2[%c0_1, %c0_2] : memref<16x4xf32, #tpu.memory_space<vmem>>, vector<16x4xf32>
    %cst = arith.constant dense<0.000000e+00> : vector<128x4xf32>
    %2 = tpu.matmul %0, %1, %cst {dimension_numbers = #tpu.dot_dimension_numbers<[1], [0], [0], [1], [0, 0, 1, 1], [], []>} : vector<128x16xf32>, vector<16x4xf32>, vector<128x4xf32> -> vector<128x4xf32>
    %c0_3 = arith.constant 0 : index
    %c0_4 = arith.constant 0 : index
    %3 = vector.load %arg3[%c0_3, %c0_4] : memref<128x4xf32, #tpu.memory_space<vmem>>, vector<128x4xf32>
    tpu.vector_store %arg3[%c0_3, %c0_4], %2 {strides = array<i32>} : memref<128x4xf32, #tpu.memory_space<vmem>>, vector<128x4xf32>,
    %cst_5 = arith.constant dense<0.000000e+00> : vector<4xf32>
    %4 = vector.multi_reduction <add>, %2, %cst_5 [0] : vector<128x4xf32> to vector<4xf32>
    %5 = vector.shape_cast %4 : vector<4xf32> to vector<1x4xf32>
    %c0_6 = arith.constant 0 : index
    %c0_7 = arith.constant 0 : index
    %c0_8 = arith.constant 0 : index
    %6 = vector.load %arg4[%c0_6, %c0_7, %c0_8] : memref<1x1x4xf32, #tpu.memory_space<vmem>>, vector<1x1x4xf32>
    %7 = vector.shape_cast %6 : vector<1x1x4xf32> to vector<1x4xf32>
    %8 = vector.shape_cast %5 : vector<1x4xf32> to vector<1x1x4xf32>
    tpu.vector_store %arg4[%c0_6, %c0_7, %c0_8], %8 {strides = array<i32>} : memref<1x1x4xf32, #tpu.memory_space<vmem>>, vector<1x1x4xf32>,
    %9 = arith.mulf %2, %2 : vector<128x4xf32>
    %cst_9 = arith.constant dense<0.000000e+00> : vector<4xf32>
    %10 = vector.multi_reduction <add>, %9, %cst_9 [0] : vector<128x4xf32> to vector<4xf32>
    %11 = vector.shape_cast %10 : vector<4xf32> to vector<1x4xf32>
    %c0_10 = arith.constant 0 : index
    %c0_11 = arith.constant 0 : index
    %c0_12 = arith.constant 0 : index
    %12 = vector.load %arg5[%c0_10, %c0_11, %c0_12] : memref<1x1x4xf32, #tpu.memory_space<vmem>>, vector<1x1x4xf32>
    %13 = vector.shape_cast %12 : vector<1x1x4xf32> to vector<1x4xf32>
    %14 = vector.shape_cast %11 : vector<1x4xf32> to vector<1x1x4xf32>
    tpu.vector_store %arg5[%c0_10, %c0_11, %c0_12], %14 {strides = array<i32>} : memref<1x1x4xf32, #tpu.memory_space<vmem>>, vector<1x1x4xf32>,
    return
  }
  func.func @transform_0(%arg0: i32) -> (i32, i32) {
    %c0_i32 = arith.constant 0 : i32
    %c0_i32_0 = arith.constant 0 : i32
    return %arg0, %c0_i32 : i32, i32
  }
  func.func @transform_1(%arg0: i32) -> (i32, i32) {
    %c0_i32 = arith.constant 0 : i32
    %c0_i32_0 = arith.constant 0 : i32
    %c0_i32_1 = arith.constant 0 : i32
    return %c0_i32, %c0_i32_0 : i32, i32
  }
  func.func @transform_2(%arg0: i32) -> (i32, i32) {
    %c0_i32 = arith.constant 0 : i32
    %c0_i32_0 = arith.constant 0 : i32
    return %arg0, %c0_i32 : i32, i32
  }
  func.func @transform_3(%arg0: i32) -> (i32, i32, i32) {
    %c0_i32 = arith.constant 0 : i32
    %c0_i32_0 = arith.constant 0 : i32
    %c0_i32_1 = arith.constant 0 : i32
    return %arg0, %c0_i32, %c0_i32_0 : i32, i32, i32
  }
  func.func @transform_4(%arg0: i32) -> (i32, i32, i32) {
    %c0_i32 = arith.constant 0 : i32
    %c0_i32_0 = arith.constant 0 : i32
    %c0_i32_1 = arith.constant 0 : i32
    return %arg0, %c0_i32, %c0_i32_0 : i32, i32, i32
  }
}

module attributes {stable_mosaic.version = 11 : i64} {
  func.func @_conv3x3_stats_kernel(%arg0: i32, %arg1: memref<1x8x8x4xf32, #tpu.memory_space<vmem>>, %arg2: memref<36x4xf32, #tpu.memory_space<vmem>>, %arg3: memref<1x4xf32, #tpu.memory_space<vmem>>, %arg4: memref<1x4xf32, #tpu.memory_space<vmem>>, %arg5: memref<1x64x4xf32, #tpu.memory_space<vmem>>, %arg6: memref<1x1x4xf32, #tpu.memory_space<vmem>>, %arg7: memref<1x1x4xf32, #tpu.memory_space<vmem>>, %arg8: memref<10x10x4xf32, #tpu.memory_space<vmem>>, %arg9: memref<64x36xf32, #tpu.memory_space<vmem>>) attributes {dimension_semantics = [#tpu.dimension_semantics<parallel>], iteration_bounds = array<i64: 2>, scalar_prefetch = 0 : i64, scratch_operands = 2 : i64, tpu.core_type = #tpu.core_type<tc>, window_params = [{transform_indices = @transform_0, window_bounds = array<i64: 1, 8, 8, 4>}, {pipeline_mode = #tpu.pipeline_mode<synchronous>, transform_indices = @transform_1, window_bounds = array<i64: 36, 4>}, {pipeline_mode = #tpu.pipeline_mode<synchronous>, transform_indices = @transform_2, window_bounds = array<i64: 1, 4>}, {pipeline_mode = #tpu.pipeline_mode<synchronous>, transform_indices = @transform_3, window_bounds = array<i64: 1, 4>}, {transform_indices = @transform_4, window_bounds = array<i64: 1, 64, 4>}, {transform_indices = @transform_5, window_bounds = array<i64: 1, 1, 4>}, {transform_indices = @transform_6, window_bounds = array<i64: 1, 1, 4>}]} {
    %c0 = arith.constant 0 : index
    %c0_0 = arith.constant 0 : index
    %0 = vector.load %arg3[%c0, %c0_0] : memref<1x4xf32, #tpu.memory_space<vmem>>, vector<1x4xf32>
    %1 = vector.shape_cast %0 : vector<1x4xf32> to vector<1x1x4xf32>
    %c0_1 = arith.constant 0 : index
    %c0_2 = arith.constant 0 : index
    %2 = vector.load %arg4[%c0_1, %c0_2] : memref<1x4xf32, #tpu.memory_space<vmem>>, vector<1x4xf32>
    %3 = vector.shape_cast %2 : vector<1x4xf32> to vector<1x1x4xf32>
    %c0_3 = arith.constant 0 : index
    %c0_4 = arith.constant 0 : index
    %c0_5 = arith.constant 0 : index
    %c0_6 = arith.constant 0 : index
    %4 = vector.load %arg1[%c0_3, %c0_4, %c0_5, %c0_6] : memref<1x8x8x4xf32, #tpu.memory_space<vmem>>, vector<1x8x8x4xf32>
    %5 = vector.shape_cast %4 : vector<1x8x8x4xf32> to vector<8x8x4xf32>
    %6 = vector.broadcast %1 : vector<1x1x4xf32> to vector<8x8x4xf32>
    %7 = arith.mulf %5, %6 : vector<8x8x4xf32>
    %8 = vector.broadcast %3 : vector<1x1x4xf32> to vector<8x8x4xf32>
    %9 = arith.addf %7, %8 : vector<8x8x4xf32>
    %cst = arith.constant 0.000000e+00 : f32
    %10 = vector.broadcast %cst : f32 to vector<8x8x4xf32>
    %11 = arith.maximumf %9, %10 : vector<8x8x4xf32>
    %cst_7 = arith.constant 0.000000e+00 : f32
    %12 = vector.broadcast %cst_7 : f32 to vector<10x10x4xf32>
    %c0_8 = arith.constant 0 : index
    %c0_9 = arith.constant 0 : index
    %c0_10 = arith.constant 0 : index
    %13 = vector.load %arg8[%c0_8, %c0_9, %c0_10] : memref<10x10x4xf32, #tpu.memory_space<vmem>>, vector<10x10x4xf32>
    tpu.vector_store %arg8[%c0_8, %c0_9, %c0_10], %12 {strides = array<i32>} : memref<10x10x4xf32, #tpu.memory_space<vmem>>, vector<10x10x4xf32>,
    %c1 = arith.constant 1 : index
    %c1_11 = arith.constant 1 : index
    %c0_12 = arith.constant 0 : index
    %14 = vector.load %arg8[%c1, %c1_11, %c0_12] : memref<10x10x4xf32, #tpu.memory_space<vmem>>, vector<8x8x4xf32>
    tpu.vector_store %arg8[%c1, %c1_11, %c0_12], %11 {strides = array<i32>} : memref<10x10x4xf32, #tpu.memory_space<vmem>>, vector<8x8x4xf32>,
    %c0_13 = arith.constant 0 : index
    %c0_14 = arith.constant 0 : index
    %c0_15 = arith.constant 0 : index
    %15 = vector.load %arg8[%c0_13, %c0_14, %c0_15] : memref<10x10x4xf32, #tpu.memory_space<vmem>>, vector<8x8x4xf32>
    %16 = vector.shape_cast %15 : vector<8x8x4xf32> to vector<64x4xf32>
    %c0_16 = arith.constant 0 : index
    %c0_17 = arith.constant 0 : index
    %17 = vector.load %arg9[%c0_16, %c0_17] : memref<64x36xf32, #tpu.memory_space<vmem>>, vector<64x4xf32>
    tpu.vector_store %arg9[%c0_16, %c0_17], %16 {strides = array<i32>} : memref<64x36xf32, #tpu.memory_space<vmem>>, vector<64x4xf32>,
    %c0_18 = arith.constant 0 : index
    %c1_19 = arith.constant 1 : index
    %c0_20 = arith.constant 0 : index
    %18 = vector.load %arg8[%c0_18, %c1_19, %c0_20] : memref<10x10x4xf32, #tpu.memory_space<vmem>>, vector<8x8x4xf32>
    %19 = vector.shape_cast %18 : vector<8x8x4xf32> to vector<64x4xf32>
    %c0_21 = arith.constant 0 : index
    %c4 = arith.constant 4 : index
    %20 = vector.load %arg9[%c0_21, %c4] : memref<64x36xf32, #tpu.memory_space<vmem>>, vector<64x4xf32>
    tpu.vector_store %arg9[%c0_21, %c4], %19 {strides = array<i32>} : memref<64x36xf32, #tpu.memory_space<vmem>>, vector<64x4xf32>,
    %c0_22 = arith.constant 0 : index
    %c2 = arith.constant 2 : index
    %c0_23 = arith.constant 0 : index
    %21 = vector.load %arg8[%c0_22, %c2, %c0_23] : memref<10x10x4xf32, #tpu.memory_space<vmem>>, vector<8x8x4xf32>
    %22 = vector.shape_cast %21 : vector<8x8x4xf32> to vector<64x4xf32>
    %c0_24 = arith.constant 0 : index
    %c8 = arith.constant 8 : index
    %23 = vector.load %arg9[%c0_24, %c8] : memref<64x36xf32, #tpu.memory_space<vmem>>, vector<64x4xf32>
    tpu.vector_store %arg9[%c0_24, %c8], %22 {strides = array<i32>} : memref<64x36xf32, #tpu.memory_space<vmem>>, vector<64x4xf32>,
    %c1_25 = arith.constant 1 : index
    %c0_26 = arith.constant 0 : index
    %c0_27 = arith.constant 0 : index
    %24 = vector.load %arg8[%c1_25, %c0_26, %c0_27] : memref<10x10x4xf32, #tpu.memory_space<vmem>>, vector<8x8x4xf32>
    %25 = vector.shape_cast %24 : vector<8x8x4xf32> to vector<64x4xf32>
    %c0_28 = arith.constant 0 : index
    %c12 = arith.constant 12 : index
    %26 = vector.load %arg9[%c0_28, %c12] : memref<64x36xf32, #tpu.memory_space<vmem>>, vector<64x4xf32>
    tpu.vector_store %arg9[%c0_28, %c12], %25 {strides = array<i32>} : memref<64x36xf32, #tpu.memory_space<vmem>>, vector<64x4xf32>,
    %c1_29 = arith.constant 1 : index
    %c1_30 = arith.constant 1 : index
    %c0_31 = arith.constant 0 : index
    %27 = vector.load %arg8[%c1_29, %c1_30, %c0_31] : memref<10x10x4xf32, #tpu.memory_space<vmem>>, vector<8x8x4xf32>
    %28 = vector.shape_cast %27 : vector<8x8x4xf32> to vector<64x4xf32>
    %c0_32 = arith.constant 0 : index
    %c16 = arith.constant 16 : index
    %29 = vector.load %arg9[%c0_32, %c16] : memref<64x36xf32, #tpu.memory_space<vmem>>, vector<64x4xf32>
    tpu.vector_store %arg9[%c0_32, %c16], %28 {strides = array<i32>} : memref<64x36xf32, #tpu.memory_space<vmem>>, vector<64x4xf32>,
    %c1_33 = arith.constant 1 : index
    %c2_34 = arith.constant 2 : index
    %c0_35 = arith.constant 0 : index
    %30 = vector.load %arg8[%c1_33, %c2_34, %c0_35] : memref<10x10x4xf32, #tpu.memory_space<vmem>>, vector<8x8x4xf32>
    %31 = vector.shape_cast %30 : vector<8x8x4xf32> to vector<64x4xf32>
    %c0_36 = arith.constant 0 : index
    %c20 = arith.constant 20 : index
    %32 = vector.load %arg9[%c0_36, %c20] : memref<64x36xf32, #tpu.memory_space<vmem>>, vector<64x4xf32>
    tpu.vector_store %arg9[%c0_36, %c20], %31 {strides = array<i32>} : memref<64x36xf32, #tpu.memory_space<vmem>>, vector<64x4xf32>,
    %c2_37 = arith.constant 2 : index
    %c0_38 = arith.constant 0 : index
    %c0_39 = arith.constant 0 : index
    %33 = vector.load %arg8[%c2_37, %c0_38, %c0_39] : memref<10x10x4xf32, #tpu.memory_space<vmem>>, vector<8x8x4xf32>
    %34 = vector.shape_cast %33 : vector<8x8x4xf32> to vector<64x4xf32>
    %c0_40 = arith.constant 0 : index
    %c24 = arith.constant 24 : index
    %35 = vector.load %arg9[%c0_40, %c24] : memref<64x36xf32, #tpu.memory_space<vmem>>, vector<64x4xf32>
    tpu.vector_store %arg9[%c0_40, %c24], %34 {strides = array<i32>} : memref<64x36xf32, #tpu.memory_space<vmem>>, vector<64x4xf32>,
    %c2_41 = arith.constant 2 : index
    %c1_42 = arith.constant 1 : index
    %c0_43 = arith.constant 0 : index
    %36 = vector.load %arg8[%c2_41, %c1_42, %c0_43] : memref<10x10x4xf32, #tpu.memory_space<vmem>>, vector<8x8x4xf32>
    %37 = vector.shape_cast %36 : vector<8x8x4xf32> to vector<64x4xf32>
    %c0_44 = arith.constant 0 : index
    %c28 = arith.constant 28 : index
    %38 = vector.load %arg9[%c0_44, %c28] : memref<64x36xf32, #tpu.memory_space<vmem>>, vector<64x4xf32>
    tpu.vector_store %arg9[%c0_44, %c28], %37 {strides = array<i32>} : memref<64x36xf32, #tpu.memory_space<vmem>>, vector<64x4xf32>,
    %c2_45 = arith.constant 2 : index
    %c2_46 = arith.constant 2 : index
    %c0_47 = arith.constant 0 : index
    %39 = vector.load %arg8[%c2_45, %c2_46, %c0_47] : memref<10x10x4xf32, #tpu.memory_space<vmem>>, vector<8x8x4xf32>
    %40 = vector.shape_cast %39 : vector<8x8x4xf32> to vector<64x4xf32>
    %c0_48 = arith.constant 0 : index
    %c32 = arith.constant 32 : index
    %41 = vector.load %arg9[%c0_48, %c32] : memref<64x36xf32, #tpu.memory_space<vmem>>, vector<64x4xf32>
    tpu.vector_store %arg9[%c0_48, %c32], %40 {strides = array<i32>} : memref<64x36xf32, #tpu.memory_space<vmem>>, vector<64x4xf32>,
    %c0_49 = arith.constant 0 : index
    %c0_50 = arith.constant 0 : index
    %42 = vector.load %arg9[%c0_49, %c0_50] : memref<64x36xf32, #tpu.memory_space<vmem>>, vector<64x36xf32>
    %c0_51 = arith.constant 0 : index
    %c0_52 = arith.constant 0 : index
    %43 = vector.load %arg2[%c0_51, %c0_52] : memref<36x4xf32, #tpu.memory_space<vmem>>, vector<36x4xf32>
    %cst_53 = arith.constant dense<0.000000e+00> : vector<64x4xf32>
    %44 = tpu.matmul %42, %43, %cst_53 {dimension_numbers = #tpu.dot_dimension_numbers<[1], [0], [0], [1], [0, 0, 1, 1], [], []>} : vector<64x36xf32>, vector<36x4xf32>, vector<64x4xf32> -> vector<64x4xf32>
    %c0_54 = arith.constant 0 : index
    %c0_55 = arith.constant 0 : index
    %c0_56 = arith.constant 0 : index
    %45 = vector.load %arg5[%c0_54, %c0_55, %c0_56] : memref<1x64x4xf32, #tpu.memory_space<vmem>>, vector<1x64x4xf32>
    %46 = vector.shape_cast %45 : vector<1x64x4xf32> to vector<64x4xf32>
    %47 = vector.shape_cast %44 : vector<64x4xf32> to vector<1x64x4xf32>
    tpu.vector_store %arg5[%c0_54, %c0_55, %c0_56], %47 {strides = array<i32>} : memref<1x64x4xf32, #tpu.memory_space<vmem>>, vector<1x64x4xf32>,
    %cst_57 = arith.constant dense<0.000000e+00> : vector<4xf32>
    %48 = vector.multi_reduction <add>, %44, %cst_57 [0] : vector<64x4xf32> to vector<4xf32>
    %49 = vector.shape_cast %48 : vector<4xf32> to vector<1x4xf32>
    %c0_58 = arith.constant 0 : index
    %c0_59 = arith.constant 0 : index
    %c0_60 = arith.constant 0 : index
    %50 = vector.load %arg6[%c0_58, %c0_59, %c0_60] : memref<1x1x4xf32, #tpu.memory_space<vmem>>, vector<1x1x4xf32>
    %51 = vector.shape_cast %50 : vector<1x1x4xf32> to vector<1x4xf32>
    %52 = vector.shape_cast %49 : vector<1x4xf32> to vector<1x1x4xf32>
    tpu.vector_store %arg6[%c0_58, %c0_59, %c0_60], %52 {strides = array<i32>} : memref<1x1x4xf32, #tpu.memory_space<vmem>>, vector<1x1x4xf32>,
    %53 = arith.mulf %44, %44 : vector<64x4xf32>
    %cst_61 = arith.constant dense<0.000000e+00> : vector<4xf32>
    %54 = vector.multi_reduction <add>, %53, %cst_61 [0] : vector<64x4xf32> to vector<4xf32>
    %55 = vector.shape_cast %54 : vector<4xf32> to vector<1x4xf32>
    %c0_62 = arith.constant 0 : index
    %c0_63 = arith.constant 0 : index
    %c0_64 = arith.constant 0 : index
    %56 = vector.load %arg7[%c0_62, %c0_63, %c0_64] : memref<1x1x4xf32, #tpu.memory_space<vmem>>, vector<1x1x4xf32>
    %57 = vector.shape_cast %56 : vector<1x1x4xf32> to vector<1x4xf32>
    %58 = vector.shape_cast %55 : vector<1x4xf32> to vector<1x1x4xf32>
    tpu.vector_store %arg7[%c0_62, %c0_63, %c0_64], %58 {strides = array<i32>} : memref<1x1x4xf32, #tpu.memory_space<vmem>>, vector<1x1x4xf32>,
    return
  }
  func.func @transform_0(%arg0: i32) -> (i32, i32, i32, i32) {
    %c0_i32 = arith.constant 0 : i32
    %c0_i32_0 = arith.constant 0 : i32
    %c0_i32_1 = arith.constant 0 : i32
    %c0_i32_2 = arith.constant 0 : i32
    return %arg0, %c0_i32, %c0_i32_0, %c0_i32_1 : i32, i32, i32, i32
  }
  func.func @transform_1(%arg0: i32) -> (i32, i32) {
    %c0_i32 = arith.constant 0 : i32
    %c0_i32_0 = arith.constant 0 : i32
    %c0_i32_1 = arith.constant 0 : i32
    return %c0_i32, %c0_i32_0 : i32, i32
  }
  func.func @transform_2(%arg0: i32) -> (i32, i32) {
    %c0_i32 = arith.constant 0 : i32
    %c0_i32_0 = arith.constant 0 : i32
    %c0_i32_1 = arith.constant 0 : i32
    return %c0_i32, %c0_i32_0 : i32, i32
  }
  func.func @transform_3(%arg0: i32) -> (i32, i32) {
    %c0_i32 = arith.constant 0 : i32
    %c0_i32_0 = arith.constant 0 : i32
    %c0_i32_1 = arith.constant 0 : i32
    return %c0_i32, %c0_i32_0 : i32, i32
  }
  func.func @transform_4(%arg0: i32) -> (i32, i32, i32) {
    %c0_i32 = arith.constant 0 : i32
    %c0_i32_0 = arith.constant 0 : i32
    %c0_i32_1 = arith.constant 0 : i32
    return %arg0, %c0_i32, %c0_i32_0 : i32, i32, i32
  }
  func.func @transform_5(%arg0: i32) -> (i32, i32, i32) {
    %c0_i32 = arith.constant 0 : i32
    %c0_i32_0 = arith.constant 0 : i32
    %c0_i32_1 = arith.constant 0 : i32
    return %arg0, %c0_i32, %c0_i32_0 : i32, i32, i32
  }
  func.func @transform_6(%arg0: i32) -> (i32, i32, i32) {
    %c0_i32 = arith.constant 0 : i32
    %c0_i32_0 = arith.constant 0 : i32
    %c0_i32_1 = arith.constant 0 : i32
    return %arg0, %c0_i32, %c0_i32_0 : i32, i32, i32
  }
}

module attributes {stable_mosaic.version = 11 : i64} {
  func.func @_bn_relu_conv1_stats_kernel(%arg0: i32, %arg1: memref<128x4xf32, #tpu.memory_space<vmem>>, %arg2: memref<4x16xf32, #tpu.memory_space<vmem>>, %arg3: memref<1x4xf32, #tpu.memory_space<vmem>>, %arg4: memref<1x4xf32, #tpu.memory_space<vmem>>, %arg5: memref<128x16xf32, #tpu.memory_space<vmem>>, %arg6: memref<1x1x16xf32, #tpu.memory_space<vmem>>, %arg7: memref<1x1x16xf32, #tpu.memory_space<vmem>>) attributes {dimension_semantics = [#tpu.dimension_semantics<parallel>], iteration_bounds = array<i64: 1>, scalar_prefetch = 0 : i64, scratch_operands = 0 : i64, tpu.core_type = #tpu.core_type<tc>, window_params = [{transform_indices = @transform_0, window_bounds = array<i64: 128, 4>}, {pipeline_mode = #tpu.pipeline_mode<synchronous>, transform_indices = @transform_1, window_bounds = array<i64: 4, 16>}, {pipeline_mode = #tpu.pipeline_mode<synchronous>, transform_indices = @transform_2, window_bounds = array<i64: 1, 4>}, {pipeline_mode = #tpu.pipeline_mode<synchronous>, transform_indices = @transform_3, window_bounds = array<i64: 1, 4>}, {transform_indices = @transform_4, window_bounds = array<i64: 128, 16>}, {transform_indices = @transform_5, window_bounds = array<i64: 1, 1, 16>}, {transform_indices = @transform_6, window_bounds = array<i64: 1, 1, 16>}]} {
    %c0 = arith.constant 0 : index
    %c0_0 = arith.constant 0 : index
    %0 = vector.load %arg1[%c0, %c0_0] : memref<128x4xf32, #tpu.memory_space<vmem>>, vector<128x4xf32>
    %c0_1 = arith.constant 0 : index
    %c0_2 = arith.constant 0 : index
    %1 = vector.load %arg3[%c0_1, %c0_2] : memref<1x4xf32, #tpu.memory_space<vmem>>, vector<1x4xf32>
    %2 = vector.broadcast %1 : vector<1x4xf32> to vector<128x4xf32>
    %3 = arith.mulf %0, %2 : vector<128x4xf32>
    %c0_3 = arith.constant 0 : index
    %c0_4 = arith.constant 0 : index
    %4 = vector.load %arg4[%c0_3, %c0_4] : memref<1x4xf32, #tpu.memory_space<vmem>>, vector<1x4xf32>
    %5 = vector.broadcast %4 : vector<1x4xf32> to vector<128x4xf32>
    %6 = arith.addf %3, %5 : vector<128x4xf32>
    %cst = arith.constant 0.000000e+00 : f32
    %7 = vector.broadcast %cst : f32 to vector<128x4xf32>
    %8 = arith.maximumf %6, %7 : vector<128x4xf32>
    %c0_5 = arith.constant 0 : index
    %c0_6 = arith.constant 0 : index
    %9 = vector.load %arg2[%c0_5, %c0_6] : memref<4x16xf32, #tpu.memory_space<vmem>>, vector<4x16xf32>
    %cst_7 = arith.constant dense<0.000000e+00> : vector<128x16xf32>
    %10 = tpu.matmul %8, %9, %cst_7 {dimension_numbers = #tpu.dot_dimension_numbers<[1], [0], [0], [1], [0, 0, 1, 1], [], []>} : vector<128x4xf32>, vector<4x16xf32>, vector<128x16xf32> -> vector<128x16xf32>
    %c0_8 = arith.constant 0 : index
    %c0_9 = arith.constant 0 : index
    %11 = vector.load %arg5[%c0_8, %c0_9] : memref<128x16xf32, #tpu.memory_space<vmem>>, vector<128x16xf32>
    tpu.vector_store %arg5[%c0_8, %c0_9], %10 {strides = array<i32>} : memref<128x16xf32, #tpu.memory_space<vmem>>, vector<128x16xf32>,
    %cst_10 = arith.constant dense<0.000000e+00> : vector<16xf32>
    %12 = vector.multi_reduction <add>, %10, %cst_10 [0] : vector<128x16xf32> to vector<16xf32>
    %13 = vector.shape_cast %12 : vector<16xf32> to vector<1x16xf32>
    %c0_11 = arith.constant 0 : index
    %c0_12 = arith.constant 0 : index
    %c0_13 = arith.constant 0 : index
    %14 = vector.load %arg6[%c0_11, %c0_12, %c0_13] : memref<1x1x16xf32, #tpu.memory_space<vmem>>, vector<1x1x16xf32>
    %15 = vector.shape_cast %14 : vector<1x1x16xf32> to vector<1x16xf32>
    %16 = vector.shape_cast %13 : vector<1x16xf32> to vector<1x1x16xf32>
    tpu.vector_store %arg6[%c0_11, %c0_12, %c0_13], %16 {strides = array<i32>} : memref<1x1x16xf32, #tpu.memory_space<vmem>>, vector<1x1x16xf32>,
    %17 = arith.mulf %10, %10 : vector<128x16xf32>
    %cst_14 = arith.constant dense<0.000000e+00> : vector<16xf32>
    %18 = vector.multi_reduction <add>, %17, %cst_14 [0] : vector<128x16xf32> to vector<16xf32>
    %19 = vector.shape_cast %18 : vector<16xf32> to vector<1x16xf32>
    %c0_15 = arith.constant 0 : index
    %c0_16 = arith.constant 0 : index
    %c0_17 = arith.constant 0 : index
    %20 = vector.load %arg7[%c0_15, %c0_16, %c0_17] : memref<1x1x16xf32, #tpu.memory_space<vmem>>, vector<1x1x16xf32>
    %21 = vector.shape_cast %20 : vector<1x1x16xf32> to vector<1x16xf32>
    %22 = vector.shape_cast %19 : vector<1x16xf32> to vector<1x1x16xf32>
    tpu.vector_store %arg7[%c0_15, %c0_16, %c0_17], %22 {strides = array<i32>} : memref<1x1x16xf32, #tpu.memory_space<vmem>>, vector<1x1x16xf32>,
    return
  }
  func.func @transform_0(%arg0: i32) -> (i32, i32) {
    %c0_i32 = arith.constant 0 : i32
    %c0_i32_0 = arith.constant 0 : i32
    return %arg0, %c0_i32 : i32, i32
  }
  func.func @transform_1(%arg0: i32) -> (i32, i32) {
    %c0_i32 = arith.constant 0 : i32
    %c0_i32_0 = arith.constant 0 : i32
    %c0_i32_1 = arith.constant 0 : i32
    return %c0_i32, %c0_i32_0 : i32, i32
  }
  func.func @transform_2(%arg0: i32) -> (i32, i32) {
    %c0_i32 = arith.constant 0 : i32
    %c0_i32_0 = arith.constant 0 : i32
    %c0_i32_1 = arith.constant 0 : i32
    return %c0_i32, %c0_i32_0 : i32, i32
  }
  func.func @transform_3(%arg0: i32) -> (i32, i32) {
    %c0_i32 = arith.constant 0 : i32
    %c0_i32_0 = arith.constant 0 : i32
    %c0_i32_1 = arith.constant 0 : i32
    return %c0_i32, %c0_i32_0 : i32, i32
  }
  func.func @transform_4(%arg0: i32) -> (i32, i32) {
    %c0_i32 = arith.constant 0 : i32
    %c0_i32_0 = arith.constant 0 : i32
    return %arg0, %c0_i32 : i32, i32
  }
  func.func @transform_5(%arg0: i32) -> (i32, i32, i32) {
    %c0_i32 = arith.constant 0 : i32
    %c0_i32_0 = arith.constant 0 : i32
    %c0_i32_1 = arith.constant 0 : i32
    return %arg0, %c0_i32, %c0_i32_0 : i32, i32, i32
  }
  func.func @transform_6(%arg0: i32) -> (i32, i32, i32) {
    %c0_i32 = arith.constant 0 : i32
    %c0_i32_0 = arith.constant 0 : i32
    %c0_i32_1 = arith.constant 0 : i32
    return %arg0, %c0_i32, %c0_i32_0 : i32, i32, i32
  }
}

module attributes {stable_mosaic.version = 11 : i64} {
  func.func @_bn_residual_relu_kernel(%arg0: i32, %arg1: memref<128x16xf32, #tpu.memory_space<vmem>>, %arg2: memref<128x16xf32, #tpu.memory_space<vmem>>, %arg3: memref<1x16xf32, #tpu.memory_space<vmem>>, %arg4: memref<1x16xf32, #tpu.memory_space<vmem>>, %arg5: memref<128x16xf32, #tpu.memory_space<vmem>>) attributes {dimension_semantics = [#tpu.dimension_semantics<parallel>], iteration_bounds = array<i64: 1>, scalar_prefetch = 0 : i64, scratch_operands = 0 : i64, tpu.core_type = #tpu.core_type<tc>, window_params = [{transform_indices = @transform_0, window_bounds = array<i64: 128, 16>}, {transform_indices = @transform_1, window_bounds = array<i64: 128, 16>}, {pipeline_mode = #tpu.pipeline_mode<synchronous>, transform_indices = @transform_2, window_bounds = array<i64: 1, 16>}, {pipeline_mode = #tpu.pipeline_mode<synchronous>, transform_indices = @transform_3, window_bounds = array<i64: 1, 16>}, {transform_indices = @transform_4, window_bounds = array<i64: 128, 16>}]} {
    %c0 = arith.constant 0 : index
    %c0_0 = arith.constant 0 : index
    %0 = vector.load %arg1[%c0, %c0_0] : memref<128x16xf32, #tpu.memory_space<vmem>>, vector<128x16xf32>
    %c0_1 = arith.constant 0 : index
    %c0_2 = arith.constant 0 : index
    %1 = vector.load %arg3[%c0_1, %c0_2] : memref<1x16xf32, #tpu.memory_space<vmem>>, vector<1x16xf32>
    %2 = vector.broadcast %1 : vector<1x16xf32> to vector<128x16xf32>
    %3 = arith.mulf %0, %2 : vector<128x16xf32>
    %c0_3 = arith.constant 0 : index
    %c0_4 = arith.constant 0 : index
    %4 = vector.load %arg4[%c0_3, %c0_4] : memref<1x16xf32, #tpu.memory_space<vmem>>, vector<1x16xf32>
    %5 = vector.broadcast %4 : vector<1x16xf32> to vector<128x16xf32>
    %6 = arith.addf %3, %5 : vector<128x16xf32>
    %c0_5 = arith.constant 0 : index
    %c0_6 = arith.constant 0 : index
    %7 = vector.load %arg2[%c0_5, %c0_6] : memref<128x16xf32, #tpu.memory_space<vmem>>, vector<128x16xf32>
    %8 = arith.addf %6, %7 : vector<128x16xf32>
    %cst = arith.constant 0.000000e+00 : f32
    %9 = vector.broadcast %cst : f32 to vector<128x16xf32>
    %10 = arith.maximumf %8, %9 : vector<128x16xf32>
    %c0_7 = arith.constant 0 : index
    %c0_8 = arith.constant 0 : index
    %11 = vector.load %arg5[%c0_7, %c0_8] : memref<128x16xf32, #tpu.memory_space<vmem>>, vector<128x16xf32>
    tpu.vector_store %arg5[%c0_7, %c0_8], %10 {strides = array<i32>} : memref<128x16xf32, #tpu.memory_space<vmem>>, vector<128x16xf32>,
    return
  }
  func.func @transform_0(%arg0: i32) -> (i32, i32) {
    %c0_i32 = arith.constant 0 : i32
    %c0_i32_0 = arith.constant 0 : i32
    return %arg0, %c0_i32 : i32, i32
  }
  func.func @transform_1(%arg0: i32) -> (i32, i32) {
    %c0_i32 = arith.constant 0 : i32
    %c0_i32_0 = arith.constant 0 : i32
    return %arg0, %c0_i32 : i32, i32
  }
  func.func @transform_2(%arg0: i32) -> (i32, i32) {
    %c0_i32 = arith.constant 0 : i32
    %c0_i32_0 = arith.constant 0 : i32
    %c0_i32_1 = arith.constant 0 : i32
    return %c0_i32, %c0_i32_0 : i32, i32
  }
  func.func @transform_3(%arg0: i32) -> (i32, i32) {
    %c0_i32 = arith.constant 0 : i32
    %c0_i32_0 = arith.constant 0 : i32
    %c0_i32_1 = arith.constant 0 : i32
    return %c0_i32, %c0_i32_0 : i32, i32
  }
  func.func @transform_4(%arg0: i32) -> (i32, i32) {
    %c0_i32 = arith.constant 0 : i32
    %c0_i32_0 = arith.constant 0 : i32
    return %arg0, %c0_i32 : i32, i32
  }
}

</mosaic_0001>

<bundles_post_ra>
// kernel: bottleneck_forward.4
= control target key start
LH: loop header
LB: loop body
LE: loop exit
PB: predicated region body
PF: predicated region fallthrough
CT: control target
= control target key end

     0   :  { %10 = vsyncpa [#allocation3], 0  ;;  %s336_s18 = smov [#allocation2]   ;;  %s337_s20 = smov 128   ;;  %s503_s0 = inlined_call_operand.hbm [shape: f32[128,16], index: 0, kind: input, shape index: {}]   ;;  %s504_s1 = inlined_call_operand.vmem [shape: f32[16,4], index: 1, kind: input, shape index: {}]   ;;  %s505_s2 = inlined_call_operand.vmem [shape: f32[128,4], index: 2, kind: output, shape index: {0}]   ;;  %s506_s3 = inlined_call_operand.vmem [shape: f32[1,1,4], index: 3, kind: output, shape index: {1}]   ;;  %s507_s4 = inlined_call_operand.vmem [shape: f32[1,1,4], index: 4, kind: output, shape index: {2}]  }
   0x1   :  { %s15_s17 = sshll.u32 %s503_s0, 4  ;;  %s17_s19 = sshll.u32 %s336_s18, 4  ;;  %s16_s17 = int_to_ptr.hbm [resolvable:$true] %s15_s17  ;;  %s18_s19 = int_to_ptr.vmem [resolvable:$true] %s17_s19 }
   0x2   :  { %s338_s21 = smov 8  }
   0x3   :  { %23 = dma.hbm_to_vmem [thread:$0]  %s16_s17, 2048, %s18_s19, [#allocation3], %s337_s20, %s337_s20, %s338_s21  }
   0x4   :  { %334 = dma.done.wait [#allocation3], 2048  }
   0x5   :  { %335 = vsyncadd [#allocation3], 4294965248  ;;  %v47_v0 = vld [vmem:[%s504_s1 + $0x8] sm:$0xff]  ;;  %v46_v1 = vld [vmem:[%s504_s1] sm:$0xff]  ;;  %vm48_vm0 = vcmask 130048   ;;  %vm162_vm1 = vcmask 31744  }
   0x6   :  { %111 = vmatpush.msra.mxu0 %v47_v0  ;;  %v30_v2 = vld [vmem:[#allocation2] sm:$0xff]  ;;  %301 = vmatpush.msra.mxu1 %v47_v0  ;;  %v31_v6 = vld [vmem:[#allocation2 + $0x8] sm:$0xff]  ;;  %v32_v10 = vld [vmem:[#allocation2 + $0x10] sm:$0xff]  ;;  %vm216_vm2 = vcmask 24576  }
   0x7   :  { %v34_v3 = vld [vmem:[#allocation2 + $0x20] sm:$0xff]  ;;  %302 = vmatpush.msra.mxu2 %v47_v0  ;;  %303 = vmatpush.msra.mxu3 %v47_v0  ;;  %v35_v7 = vld [vmem:[#allocation2 + $0x28] sm:$0xff]  ;;  %v36_v11 = vld [vmem:[#allocation2 + $0x30] sm:$0xff] }
   0x8   :  { %112 = vmatpush.msra.mxu0 %v46_v1  ;;  %304 = vmatpush.msra.mxu1 %v46_v1  ;;  %v38_v4 = vld [vmem:[#allocation2 + $0x40] sm:$0xff]  ;;  %v39_v8 = vld [vmem:[#allocation2 + $0x48] sm:$0xff]  ;;  %v40_v12 = vld [vmem:[#allocation2 + $0x50] sm:$0xff] }
   0x9   :  { %v42_v5 = vld [vmem:[#allocation2 + $0x60] sm:$0xff]  ;;  %285 = vmatmul.msk.f32.vlgmr.msra.gmra.mxu0 %vm48_vm0, %v30_v2  ;;  %289 = vmatmul.msk.f32.vlgmr.msra.gmra.mxu1 %vm48_vm0, %v34_v3  ;;  %v43_v9 = vld [vmem:[#allocation2 + $0x68] sm:$0xff]  ;;  %v44_v13 = vld [vmem:[#allocation2 + $0x70] sm:$0xff] }
   0xa   :  { %305 = vmatpush.msra.mxu2 %v46_v1  ;;  %306 = vmatpush.msra.mxu3 %v46_v1  ;;  %v33_v14 = vld [vmem:[#allocation2 + $0x18] sm:$0xff] }
   0xb   :  { %293 = vmatmul.msk.f32.vlgmr.msra.gmra.mxu2 %vm48_vm0, %v38_v4  ;;  %297 = vmatmul.msk.f32.vlgmr.msra.gmra.mxu3 %vm48_vm0, %v42_v5  ;;  %v37_v15 = vld [vmem:[#allocation2 + $0x38] sm:$0xff] }
   0xc   :  { %v41_v16 = vld [vmem:[#allocation2 + $0x58] sm:$0xff] }
   0xd   :  { %v45_v17 = vld [vmem:[#allocation2 + $0x78] sm:$0xff] }
  0x11   :  { %286 = vmatmul.msk.f32.gmra.mxu0 %vm48_vm0, %v31_v6  ;;  %290 = vmatmul.msk.f32.gmra.mxu1 %vm48_vm0, %v35_v7 }
  0x13   :  { %294 = vmatmul.msk.f32.gmra.mxu2 %vm48_vm0, %v39_v8  ;;  %298 = vmatmul.msk.f32.gmra.mxu3 %vm48_vm0, %v43_v9 }
  0x19   :  { %287 = vmatmul.msk.f32.gmra.mxu0 %vm48_vm0, %v32_v10  ;;  %291 = vmatmul.msk.f32.gmra.mxu1 %vm48_vm0, %v36_v11 }
  0x1b   :  { %295 = vmatmul.msk.f32.gmra.mxu2 %vm48_vm0, %v40_v12  ;;  %299 = vmatmul.msk.f32.gmra.mxu3 %vm48_vm0, %v44_v13 }
  0x21   :  { %288 = vmatmul.msk.f32.gmra.mxu0 %vm48_vm0, %v33_v14  ;;  %292 = vmatmul.msk.f32.gmra.mxu1 %vm48_vm0, %v37_v15 }
  0x23   :  { %296 = vmatmul.msk.f32.gmra.mxu2 %vm48_vm0, %v41_v16  ;;  %300 = vmatmul.msk.f32.gmra.mxu3 %vm48_vm0, %v45_v17 }
  0x86   :  { %v114_v18 = vpop.f32.mrf.mxu0  ;;  %v126_v19 = vpop.f32.mrf.mxu1 }
  0x87   :  { %163 = vst.msk [vmem:[%s505_s2] sm:$0xff] %vm162_vm1, %v114_v18  ;;  %v218_v29 = vmul.f32 %v114_v18, %v114_v18  ;;  %v179_v32 = vsel %vm162_vm1, %v114_v18, 0.0  ;;  %v222_v42 = vmul.f32 %v126_v19, %v126_v19  ;;  %v186_v49 = vsel %vm162_vm1, %v126_v19, 0.0 }
  0x88   :  { %167 = vst.msk [vmem:[%s505_s2 + $0x20] sm:$0xff] %vm162_vm1, %v126_v19 }
  0x89   :  { %v234_v36 = vsel %vm162_vm1, %v218_v29, 0.0  ;;  %v241_v54 = vsel %vm162_vm1, %v222_v42, 0.0 }
  0x8e   :  { %v117_v20 = vpop.f32.mrf.mxu0  ;;  %v129_v21 = vpop.f32.mrf.mxu1 }
  0x8f   :  { %164 = vst.msk [vmem:[%s505_s2 + $0x8] sm:$0xff] %vm162_vm1, %v117_v20  ;;  %v138_v22 = vpop.f32.mrf.mxu2  ;;  %v401_v23 = vpop.f32.mrf.mxu3  ;;  %v219_v26 = vmul.f32 %v117_v20, %v117_v20  ;;  %v180_v30 = vsel %vm162_vm1, %v117_v20, 0.0  ;;  %v223_v50 = vmul.f32 %v129_v21, %v129_v21  ;;  %v188_v55 = vsel %vm162_vm1, %v129_v21, 0.0 }
  0x90   :  { %168 = vst.msk [vmem:[%s505_s2 + $0x28] sm:$0xff] %vm162_vm1, %v129_v21  ;;  %v181_v35 = vadd.f32 %v180_v30, %v179_v32  ;;  %v226_v1 = vmul.f32 %v138_v22, %v138_v22  ;;  %v194_v8 = vsel %vm162_vm1, %v138_v22, 0.0  ;;  %v202_v30 = vsel %vm162_vm1, %v401_v23, 0.0 }
  0x91   :  { %171 = vst.msk [vmem:[%s505_s2 + $0x40] sm:$0xff] %vm162_vm1, %v138_v22  ;;  %v235_v33 = vsel %vm162_vm1, %v219_v26, 0.0  ;;  %v243_v60 = vsel %vm162_vm1, %v223_v50, 0.0 }
  0x92   :  { %175 = vst.msk [vmem:[%s505_s2 + $0x60] sm:$0xff] %vm162_vm1, %v401_v23  ;;  %v236_v38 = vadd.f32 %v235_v33, %v234_v36  ;;  %v249_v12 = vsel %vm162_vm1, %v226_v1, 0.0 }
  0x96   :  { %v120_v24 = vpop.f32.mrf.mxu0  ;;  %v132_v25 = vpop.f32.mrf.mxu1 }
  0x97   :  { %165 = vst.msk [vmem:[%s505_s2 + $0x10] sm:$0xff] %vm162_vm1, %v120_v24  ;;  %v141_v27 = vpop.f32.mrf.mxu2  ;;  %v420_v28 = vpop.f32.mrf.mxu3  ;;  %v220_v31 = vmul.f32 %v120_v24, %v120_v24  ;;  %v182_v34 = vsel %vm162_vm1, %v120_v24, 0.0  ;;  %v224_v56 = vmul.f32 %v132_v25, %v132_v25  ;;  %v190_v61 = vsel %vm162_vm1, %v132_v25, 0.0 }
  0x98   :  { %169 = vst.msk [vmem:[%s505_s2 + $0x30] sm:$0xff] %vm162_vm1, %v132_v25  ;;  %v183_v39 = vadd.f32 %v182_v34, %v181_v35  ;;  %v227_v9 = vmul.f32 %v141_v27, %v141_v27  ;;  %v196_v13 = vsel %vm162_vm1, %v141_v27, 0.0  ;;  %v230_v24 = vmul.f32 %v401_v23, %v401_v23 }
  0x99   :  { %172 = vst.msk [vmem:[%s505_s2 + $0x48] sm:$0xff] %vm162_vm1, %v141_v27  ;;  %v237_v37 = vsel %vm162_vm1, %v220_v31, 0.0  ;;  %v245_v2 = vsel %vm162_vm1, %v224_v56, 0.0  ;;  %v231_v31 = vmul.f32 %v420_v28, %v420_v28  ;;  %v204_v35 = vsel %vm162_vm1, %v420_v28, 0.0 }
  0x9a   :  { %176 = vst.msk [vmem:[%s505_s2 + $0x68] sm:$0xff] %vm162_vm1, %v420_v28  ;;  %v238_v47 = vadd.f32 %v237_v37, %v236_v38  ;;  %v251_v18 = vsel %vm162_vm1, %v227_v9, 0.0  ;;  %v257_v34 = vsel %vm162_vm1, %v230_v24, 0.0 }
  0x9e   :  { %v123_v40 = vpop.f32.mrf.mxu0  ;;  %v135_v41 = vpop.f32.mrf.mxu1 }
  0x9f   :  { %166 = vst.msk [vmem:[%s505_s2 + $0x18] sm:$0xff] %vm162_vm1, %v123_v40  ;;  %v184_v43 = vsel %vm162_vm1, %v123_v40, 0.0  ;;  %v221_v44 = vmul.f32 %v123_v40, %v123_v40  ;;  %v144_v45 = vpop.f32.mrf.mxu2  ;;  %v156_v46 = vpop.f32.mrf.mxu3  ;;  %v225_v57 = vmul.f32 %v135_v41, %v135_v41  ;;  %v192_v62 = vsel %vm162_vm1, %v135_v41, 0.0 }
  0xa0   :  { %v185_v48 = vadd.f32 %v184_v43, %v183_v39  ;;  %170 = vst.msk [vmem:[%s505_s2 + $0x38] sm:$0xff] %vm162_vm1, %v135_v41  ;;  %v228_v14 = vmul.f32 %v144_v45, %v144_v45  ;;  %v198_v19 = vsel %vm162_vm1, %v144_v45, 0.0  ;;  %v232_v36 = vmul.f32 %v156_v46, %v156_v46 }
  0xa1   :  { %v239_v51 = vsel %vm162_vm1, %v221_v44, 0.0  ;;  %173 = vst.msk [vmem:[%s505_s2 + $0x50] sm:$0xff] %vm162_vm1, %v144_v45  ;;  %v247_v3 = vsel %vm162_vm1, %v225_v57, 0.0  ;;  %v259_v40 = vsel %vm162_vm1, %v231_v31, 0.0  ;;  %v206_v41 = vsel %vm162_vm1, %v156_v46, 0.0 }
  0xa2   :  { %v187_v52 = vadd.f32 %v186_v49, %v185_v48  ;;  %v240_v53 = vadd.f32 %v239_v51, %v238_v47  ;;  %177 = vst.msk [vmem:[%s505_s2 + $0x70] sm:$0xff] %vm162_vm1, %v156_v46  ;;  %v253_v25 = vsel %vm162_vm1, %v228_v14, 0.0  ;;  %v261_v44 = vsel %vm162_vm1, %v232_v36, 0.0 }
  0xa4   :  { %v242_v58 = vadd.f32 %v241_v54, %v240_v53  ;;  %v189_v59 = vadd.f32 %v188_v55, %v187_v52 }
  0xa6   :  { %v191_v63 = vadd.f32 %v190_v61, %v189_v59  ;;  %v244_v0 = vadd.f32 %v243_v60, %v242_v58 }
  0xa7   :  { %v147_v4 = vpop.f32.mrf.mxu2  ;;  %v159_v5 = vpop.f32.mrf.mxu3 }
  0xa8   :  { %v246_v6 = vadd.f32 %v245_v2, %v244_v0  ;;  %v193_v7 = vadd.f32 %v192_v62, %v191_v63  ;;  %174 = vst.msk [vmem:[%s505_s2 + $0x58] sm:$0xff] %vm162_vm1, %v147_v4  ;;  %v229_v15 = vmul.f32 %v147_v4, %v147_v4  ;;  %v200_v20 = vsel %vm162_vm1, %v147_v4, 0.0 }
  0xa9   :  { %178 = vst.msk [vmem:[%s505_s2 + $0x78] sm:$0xff] %vm162_vm1, %v159_v5  ;;  %v233_v37 = vmul.f32 %v159_v5, %v159_v5  ;;  %v208_v23 = vsel %vm162_vm1, %v159_v5, 0.0 }
  0xaa   :  { %v195_v10 = vadd.f32 %v194_v8, %v193_v7  ;;  %v248_v11 = vadd.f32 %v247_v3, %v246_v6  ;;  %v255_v26 = vsel %vm162_vm1, %v229_v15, 0.0 }
  0xab   :  { %v263_v45 = vsel %vm162_vm1, %v233_v37, 0.0 }
  0xac   :  { %v250_v16 = vadd.f32 %v249_v12, %v248_v11  ;;  %v197_v17 = vadd.f32 %v196_v13, %v195_v10 }
  0xae   :  { %v199_v21 = vadd.f32 %v198_v19, %v197_v17  ;;  %v252_v22 = vadd.f32 %v251_v18, %v250_v16 }
  0xb0   :  { %v254_v27 = vadd.f32 %v253_v25, %v252_v22  ;;  %v201_v29 = vadd.f32 %v200_v20, %v199_v21 }
  0xb2   :  { %v203_v32 = vadd.f32 %v202_v30, %v201_v29  ;;  %v256_v33 = vadd.f32 %v255_v26, %v254_v27 }
  0xb4   :  { %v258_v38 = vadd.f32 %v257_v34, %v256_v33  ;;  %v205_v39 = vadd.f32 %v204_v35, %v203_v32 }
  0xb6   :  { %v207_v42 = vadd.f32 %v206_v41, %v205_v39  ;;  %v260_v43 = vadd.f32 %v259_v40, %v258_v38 }
  0xb8   :  { %v262_v47 = vadd.f32 %v261_v44, %v260_v43  ;;  %v209_v48 = vadd.f32 %v208_v23, %v207_v42 }
  0xba   :  { %v210_v49 = vrot.slane %v209_v48, 4  ;;  %v264_v28 = vadd.f32 %v263_v45, %v262_v47 }
  0xbc   :  { %v211_v50 = vadd.f32 %v210_v49, %v209_v48  ;;  %v265_v51 = vrot.slane %v264_v28, 4 }
  0xbe   :  { %v212_v52 = vrot.slane %v211_v50, 2  ;;  %v266_v53 = vadd.f32 %v265_v51, %v264_v28 }
  0xc0   :  { %v213_v54 = vadd.f32 %v212_v52, %v211_v50  ;;  %v267_v55 = vrot.slane %v266_v53, 2 }
  0xc2   :  { %v214_v56 = vrot.slane %v213_v54, 1  ;;  %v268_v46 = vadd.f32 %v267_v55, %v266_v53 }
  0xc4   :  { %v215_v57 = vadd.f32 %v214_v56, %v213_v54  ;;  %v269_v58 = vrot.slane %v268_v46, 1 }
  0xc6   :  { %217 = vst.msk [vmem:[%s506_s3] sm:$0x1] %vm216_vm2, %v215_v57  ;;  %v270_v59 = vadd.f32 %v269_v58, %v268_v46 }
  0xc8   :  { %271 = vst.msk [vmem:[%s507_s4] sm:$0x1] %vm216_vm2, %v270_v59 }
  0xc9   :  { %284 = vsyncpa [#allocation3], 1 }

// kernel: bottleneck_forward.6
= control target key start
LH: loop header
LB: loop body
LE: loop exit
PB: predicated region body
PF: predicated region fallthrough
CT: control target
= control target key end

     0   :  { %vm142_vm0 = vcmask 1043456   ;;  %vm93_vm1 = vcmask 31744   ;;  %vm211_vm2 = vcmask 130048   ;;  %vm265_vm3 = vcmask 122880   ;;  %s625_s1 = inlined_call_operand.vmem [shape: f32[4,16], index: 1, kind: input, shape index: {}]   ;;  %s626_s0 = inlined_call_operand.vmem [shape: f32[128,4], index: 0, kind: input, shape index: {}]   ;;  %s627_s2 = inlined_call_operand.vmem [shape: f32[1,4], index: 2, kind: input, shape index: {}]   ;;  %s628_s3 = inlined_call_operand.vmem [shape: f32[1,4], index: 3, kind: input, shape index: {}]   ;;  %s629_s4 = inlined_call_operand.vmem [shape: f32[128,16], index: 4, kind: output, shape index: {0}]   ;;  %s630_s5 = inlined_call_operand.vmem [shape: f32[1,1,16], index: 5, kind: output, shape index: {1}]   ;;  %s631_s6 = inlined_call_operand.vmem [shape: f32[1,1,16], index: 6, kind: output, shape index: {2}]  }
   0x1   :  { %v92_v0 = vld [vmem:[%s625_s1] sm:$0xf]  ;;  %v21_v4 = vld [vmem:[%s626_s0 + $0x8] sm:$0xff]  ;;  %v22_v27 = vld [vmem:[%s626_s0 + $0x10] sm:$0xff] }
   0x2   :  { %v20_v1 = vld [vmem:[%s626_s0] sm:$0xff]  ;;  %333 = vmatpush.msk.msra.mxu0 %vm142_vm0, %v92_v0  ;;  %350 = vmatpush.msk.msra.mxu1 %vm142_vm0, %v92_v0  ;;  %v25_v10 = vld [vmem:[%s626_s0 + $0x28] sm:$0xff]  ;;  %v26_v30 = vld [vmem:[%s626_s0 + $0x30] sm:$0xff] }
   0x3   :  { %v399_v2 = vld [vmem:[%s627_s2] ss:$0 sm:$0xff]  ;;  %351 = vmatpush.msk.msra.mxu2 %vm142_vm0, %v92_v0  ;;  %352 = vmatpush.msk.msra.mxu3 %vm142_vm0, %v92_v0  ;;  %v29_v11 = vld [vmem:[%s626_s0 + $0x48] sm:$0xff]  ;;  %v30_v32 = vld [vmem:[%s626_s0 + $0x50] sm:$0xff] }
   0x4   :  { %v404_v3 = vld [vmem:[%s628_s3] ss:$0 sm:$0xff]  ;;  %v40_v7 = vmul.f32 %v399_v2, %v20_v1  ;;  %v41_v12 = vmul.f32 %v399_v2, %v21_v4  ;;  %v45_v17 = vmul.f32 %v399_v2, %v25_v10  ;;  %v49_v18 = vmul.f32 %v399_v2, %v29_v11  ;;  %v33_v23 = vld [vmem:[%s626_s0 + $0x68] sm:$0xff]  ;;  %v34_v38 = vld [vmem:[%s626_s0 + $0x70] sm:$0xff] }
   0x5   :  { %v24_v5 = vld [vmem:[%s626_s0 + $0x20] sm:$0xff]  ;;  %v53_v31 = vmul.f32 %v399_v2, %v33_v23  ;;  %v42_v35 = vmul.f32 %v399_v2, %v22_v27  ;;  %v46_v37 = vmul.f32 %v399_v2, %v26_v30  ;;  %v50_v40 = vmul.f32 %v399_v2, %v30_v32  ;;  %v23_v45 = vld [vmem:[%s626_s0 + $0x18] sm:$0xff] }
   0x6   :  { %v28_v6 = vld [vmem:[%s626_s0 + $0x40] sm:$0xff]  ;;  %v44_v8 = vmul.f32 %v399_v2, %v24_v5  ;;  %v60_v14 = vadd.f32 %v404_v3, %v40_v7  ;;  %v61_v25 = vadd.f32 %v404_v3, %v41_v12  ;;  %v65_v26 = vadd.f32 %v404_v3, %v45_v17  ;;  %v27_v47 = vld [vmem:[%s626_s0 + $0x38] sm:$0xff] }
   0x7   :  { %v48_v9 = vmul.f32 %v399_v2, %v28_v6  ;;  %v32_v13 = vld [vmem:[%s626_s0 + $0x60] sm:$0xff]  ;;  %v69_v28 = vadd.f32 %v404_v3, %v49_v18  ;;  %v73_v33 = vadd.f32 %v404_v3, %v53_v31  ;;  %v54_v42 = vmul.f32 %v399_v2, %v34_v38  ;;  %v31_v48 = vld [vmem:[%s626_s0 + $0x58] sm:$0xff] }
   0x8   :  { %v64_v15 = vadd.f32 %v404_v3, %v44_v8  ;;  %v52_v19 = vmul.f32 %v399_v2, %v32_v13  ;;  %v76_v20 = vmax.f32 %v60_v14, 0.0  ;;  %v77_v34 = vmax.f32 %v61_v25, 0.0  ;;  %v35_v54 = vld [vmem:[%s626_s0 + $0x78] sm:$0xff] }
   0x9   :  { %v68_v16 = vadd.f32 %v404_v3, %v48_v9  ;;  %v81_v36 = vmax.f32 %v65_v26, 0.0  ;;  %v85_v39 = vmax.f32 %v69_v28, 0.0  ;;  %v89_v41 = vmax.f32 %v73_v33, 0.0 }
   0xa   :  { %v80_v21 = vmax.f32 %v64_v15, 0.0  ;;  %v72_v24 = vadd.f32 %v404_v3, %v52_v19  ;;  %334 = vmatmul.msk.f32.vlgmr.msra.gmra.mxu0 %vm93_vm1, %v76_v20  ;;  %v62_v43 = vadd.f32 %v404_v3, %v42_v35  ;;  %v66_v44 = vadd.f32 %v404_v3, %v46_v37 }
   0xb   :  { %v84_v22 = vmax.f32 %v68_v16, 0.0  ;;  %v70_v46 = vadd.f32 %v404_v3, %v50_v40  ;;  %v74_v49 = vadd.f32 %v404_v3, %v54_v42  ;;  %v43_v51 = vmul.f32 %v399_v2, %v23_v45 }
   0xc   :  { %338 = vmatmul.msk.f32.vlgmr.msra.gmra.mxu1 %vm93_vm1, %v80_v21  ;;  %v88_v29 = vmax.f32 %v72_v24, 0.0  ;;  %v78_v50 = vmax.f32 %v62_v43, 0.0  ;;  %v82_v52 = vmax.f32 %v66_v44, 0.0  ;;  %v47_v53 = vmul.f32 %v399_v2, %v27_v47 }
   0xd   :  { %342 = vmatmul.msk.f32.vlgmr.msra.gmra.mxu2 %vm93_vm1, %v84_v22  ;;  %v86_v55 = vmax.f32 %v70_v46, 0.0  ;;  %v51_v56 = vmul.f32 %v399_v2, %v31_v48  ;;  %v90_v57 = vmax.f32 %v74_v49, 0.0  ;;  %v55_v58 = vmul.f32 %v399_v2, %v35_v54 }
   0xe   :  { %346 = vmatmul.msk.f32.vlgmr.msra.gmra.mxu3 %vm93_vm1, %v88_v29  ;;  %v63_v59 = vadd.f32 %v404_v3, %v43_v51  ;;  %v67_v60 = vadd.f32 %v404_v3, %v47_v53 }
   0xf   :  { %v71_v61 = vadd.f32 %v404_v3, %v51_v56  ;;  %v75_v62 = vadd.f32 %v404_v3, %v55_v58 }
  0x10   :  { %v79_v63 = vmax.f32 %v63_v59, 0.0  ;;  %v83_v0 = vmax.f32 %v67_v60, 0.0 }
  0x11   :  { %v87_v1 = vmax.f32 %v71_v61, 0.0  ;;  %v91_v2 = vmax.f32 %v75_v62, 0.0 }
  0x12   :  { %335 = vmatmul.msk.f32.gmra.mxu0 %vm93_vm1, %v77_v34 }
  0x14   :  { %339 = vmatmul.msk.f32.gmra.mxu1 %vm93_vm1, %v81_v36 }
  0x15   :  { %343 = vmatmul.msk.f32.gmra.mxu2 %vm93_vm1, %v85_v39 }
  0x16   :  { %347 = vmatmul.msk.f32.gmra.mxu3 %vm93_vm1, %v89_v41 }
  0x1a   :  { %336 = vmatmul.msk.f32.gmra.mxu0 %vm93_vm1, %v78_v50 }
  0x1c   :  { %340 = vmatmul.msk.f32.gmra.mxu1 %vm93_vm1, %v82_v52 }
  0x1d   :  { %344 = vmatmul.msk.f32.gmra.mxu2 %vm93_vm1, %v86_v55 }
  0x1e   :  { %348 = vmatmul.msk.f32.gmra.mxu3 %vm93_vm1, %v90_v57 }
  0x22   :  { %337 = vmatmul.msk.f32.gmra.mxu0 %vm93_vm1, %v79_v63 }
  0x24   :  { %341 = vmatmul.msk.f32.gmra.mxu1 %vm93_vm1, %v83_v0 }
  0x25   :  { %345 = vmatmul.msk.f32.gmra.mxu2 %vm93_vm1, %v87_v1 }
  0x26   :  { %349 = vmatmul.msk.f32.gmra.mxu3 %vm93_vm1, %v91_v2 }
  0x87   :  { %v163_v4 = vpop.f32.mrf.mxu0 }
  0x88   :  { %212 = vst.msk [vmem:[%s629_s4] sm:$0xff] %vm211_vm2, %v163_v4  ;;  %v267_v14 = vmul.f32 %v163_v4, %v163_v4  ;;  %v228_v17 = vsel %vm211_vm2, %v163_v4, 0.0 }
  0x89   :  { %v175_v5 = vpop.f32.mrf.mxu1 }
  0x8a   :  { %216 = vst.msk [vmem:[%s629_s4 + $0x20] sm:$0xff] %vm211_vm2, %v175_v5  ;;  %v283_v21 = vsel %vm211_vm2, %v267_v14, 0.0  ;;  %v271_v28 = vmul.f32 %v175_v5, %v175_v5  ;;  %v235_v34 = vsel %vm211_vm2, %v175_v5, 0.0 }
  0x8c   :  { %v290_v39 = vsel %vm211_vm2, %v271_v28, 0.0 }
  0x8f   :  { %v166_v6 = vpop.f32.mrf.mxu0 }
  0x90   :  { %v507_v3 = vpop.f32.mrf.mxu2  ;;  %213 = vst.msk [vmem:[%s629_s4 + $0x8] sm:$0xff] %vm211_vm2, %v166_v6  ;;  %v268_v12 = vmul.f32 %v166_v6, %v166_v6  ;;  %v229_v15 = vsel %vm211_vm2, %v166_v6, 0.0 }
  0x91   :  { %v178_v7 = vpop.f32.mrf.mxu1  ;;  %220 = vst.msk [vmem:[%s629_s4 + $0x40] sm:$0xff] %vm211_vm2, %v507_v3  ;;  %v518_v8 = vpop.f32.mrf.mxu3  ;;  %v230_v20 = vadd.f32 %v229_v15, %v228_v17  ;;  %v275_v51 = vmul.f32 %v507_v3, %v507_v3  ;;  %v243_v57 = vsel %vm211_vm2, %v507_v3, 0.0 }
  0x92   :  { %217 = vst.msk [vmem:[%s629_s4 + $0x28] sm:$0xff] %vm211_vm2, %v178_v7  ;;  %v284_v18 = vsel %vm211_vm2, %v268_v12, 0.0  ;;  %v272_v35 = vmul.f32 %v178_v7, %v178_v7  ;;  %v237_v40 = vsel %vm211_vm2, %v178_v7, 0.0  ;;  %v251_v15 = vsel %vm211_vm2, %v518_v8, 0.0 }
  0x93   :  { %224 = vst.msk [vmem:[%s629_s4 + $0x60] sm:$0xff] %vm211_vm2, %v518_v8  ;;  %v285_v24 = vadd.f32 %v284_v18, %v283_v21  ;;  %v298_v61 = vsel %vm211_vm2, %v275_v51, 0.0 }
  0x94   :  { %v292_v45 = vsel %vm211_vm2, %v272_v35, 0.0 }
  0x97   :  { %v169_v10 = vpop.f32.mrf.mxu0 }
  0x98   :  { %v529_v9 = vpop.f32.mrf.mxu2  ;;  %214 = vst.msk [vmem:[%s629_s4 + $0x10] sm:$0xff] %vm211_vm2, %v169_v10  ;;  %v269_v16 = vmul.f32 %v169_v10, %v169_v10  ;;  %v231_v19 = vsel %vm211_vm2, %v169_v10, 0.0  ;;  %v279_v10 = vmul.f32 %v518_v8, %v518_v8 }
  0x99   :  { %v181_v11 = vpop.f32.mrf.mxu1  ;;  %221 = vst.msk [vmem:[%s629_s4 + $0x48] sm:$0xff] %vm211_vm2, %v529_v9  ;;  %v540_v13 = vpop.f32.mrf.mxu3  ;;  %v232_v25 = vadd.f32 %v231_v19, %v230_v20  ;;  %v276_v58 = vmul.f32 %v529_v9, %v529_v9  ;;  %v245_v62 = vsel %vm211_vm2, %v529_v9, 0.0 }
  0x9a   :  { %218 = vst.msk [vmem:[%s629_s4 + $0x30] sm:$0xff] %vm211_vm2, %v181_v11  ;;  %v286_v22 = vsel %vm211_vm2, %v269_v16, 0.0  ;;  %v273_v41 = vmul.f32 %v181_v11, %v181_v11  ;;  %v239_v46 = vsel %vm211_vm2, %v181_v11, 0.0  ;;  %v280_v16 = vmul.f32 %v540_v13, %v540_v13 }
  0x9b   :  { %225 = vst.msk [vmem:[%s629_s4 + $0x68] sm:$0xff] %vm211_vm2, %v540_v13  ;;  %v287_v32 = vadd.f32 %v286_v22, %v285_v24  ;;  %v300_v4 = vsel %vm211_vm2, %v276_v58, 0.0  ;;  %v306_v19 = vsel %vm211_vm2, %v279_v10, 0.0  ;;  %v253_v20 = vsel %vm211_vm2, %v540_v13, 0.0 }
  0x9c   :  { %v294_v52 = vsel %vm211_vm2, %v273_v41, 0.0 }
  0x9f   :  { %v172_v26 = vpop.f32.mrf.mxu0 }
  0xa0   :  { %v193_v23 = vpop.f32.mrf.mxu2  ;;  %215 = vst.msk [vmem:[%s629_s4 + $0x18] sm:$0xff] %vm211_vm2, %v172_v26  ;;  %v233_v29 = vsel %vm211_vm2, %v172_v26, 0.0  ;;  %v270_v30 = vmul.f32 %v172_v26, %v172_v26 }
  0xa1   :  { %v184_v27 = vpop.f32.mrf.mxu1  ;;  %222 = vst.msk [vmem:[%s629_s4 + $0x50] sm:$0xff] %vm211_vm2, %v193_v23  ;;  %v205_v31 = vpop.f32.mrf.mxu3  ;;  %v234_v33 = vadd.f32 %v233_v29, %v232_v25  ;;  %v277_v63 = vmul.f32 %v193_v23, %v193_v23  ;;  %v247_v5 = vsel %vm211_vm2, %v193_v23, 0.0  ;;  %v308_v25 = vsel %vm211_vm2, %v280_v16, 0.0 }
  0xa2   :  { %219 = vst.msk [vmem:[%s629_s4 + $0x38] sm:$0xff] %vm211_vm2, %v184_v27  ;;  %v288_v36 = vsel %vm211_vm2, %v270_v30, 0.0  ;;  %v274_v42 = vmul.f32 %v184_v27, %v184_v27  ;;  %v241_v47 = vsel %vm211_vm2, %v184_v27, 0.0  ;;  %v281_v21 = vmul.f32 %v205_v31, %v205_v31 }
  0xa3   :  { %226 = vst.msk [vmem:[%s629_s4 + $0x70] sm:$0xff] %vm211_vm2, %v205_v31  ;;  %v236_v37 = vadd.f32 %v235_v34, %v234_v33  ;;  %v289_v38 = vadd.f32 %v288_v36, %v287_v32  ;;  %v302_v11 = vsel %vm211_vm2, %v277_v63, 0.0  ;;  %v255_v26 = vsel %vm211_vm2, %v205_v31, 0.0 }
  0xa4   :  { %v296_v53 = vsel %vm211_vm2, %v274_v42, 0.0  ;;  %v310_v29 = vsel %vm211_vm2, %v281_v21, 0.0 }
  0xa5   :  { %v291_v43 = vadd.f32 %v290_v39, %v289_v38  ;;  %v238_v44 = vadd.f32 %v237_v40, %v236_v37 }
  0xa7   :  { %v240_v49 = vadd.f32 %v239_v46, %v238_v44  ;;  %v293_v50 = vadd.f32 %v292_v45, %v291_v43 }
  0xa8   :  { %v196_v48 = vpop.f32.mrf.mxu2 }
  0xa9   :  { %223 = vst.msk [vmem:[%s629_s4 + $0x58] sm:$0xff] %vm211_vm2, %v196_v48  ;;  %v208_v54 = vpop.f32.mrf.mxu3  ;;  %v295_v55 = vadd.f32 %v294_v52, %v293_v50  ;;  %v242_v56 = vadd.f32 %v241_v47, %v240_v49  ;;  %v278_v0 = vmul.f32 %v196_v48, %v196_v48  ;;  %v249_v3 = vsel %vm211_vm2, %v196_v48, 0.0 }
  0xaa   :  { %227 = vst.msk [vmem:[%s629_s4 + $0x78] sm:$0xff] %vm211_vm2, %v208_v54  ;;  %v282_v22 = vmul.f32 %v208_v54, %v208_v54  ;;  %v257_v8 = vsel %vm211_vm2, %v208_v54, 0.0 }
  0xab   :  { %v244_v59 = vadd.f32 %v243_v57, %v242_v56  ;;  %v297_v60 = vadd.f32 %v296_v53, %v295_v55  ;;  %v304_v12 = vsel %vm211_vm2, %v278_v0, 0.0 }
  0xac   :  { %v312_v30 = vsel %vm211_vm2, %v282_v22, 0.0 }
  0xad   :  { %v299_v1 = vadd.f32 %v298_v61, %v297_v60  ;;  %v246_v2 = vadd.f32 %v245_v62, %v244_v59 }
  0xaf   :  { %v248_v6 = vadd.f32 %v247_v5, %v246_v2  ;;  %v301_v7 = vadd.f32 %v300_v4, %v299_v1 }
  0xb1   :  { %v303_v9 = vadd.f32 %v302_v11, %v301_v7  ;;  %v250_v14 = vadd.f32 %v249_v3, %v248_v6 }
  0xb3   :  { %v252_v17 = vadd.f32 %v251_v15, %v250_v14  ;;  %v305_v18 = vadd.f32 %v304_v12, %v303_v9 }
  0xb5   :  { %v307_v23 = vadd.f32 %v306_v19, %v305_v18  ;;  %v254_v24 = vadd.f32 %v253_v20, %v252_v17 }
  0xb7   :  { %v256_v27 = vadd.f32 %v255_v26, %v254_v24  ;;  %v309_v28 = vadd.f32 %v308_v25, %v307_v23 }
  0xb9   :  { %v311_v32 = vadd.f32 %v310_v29, %v309_v28  ;;  %v258_v33 = vadd.f32 %v257_v8, %v256_v27 }
  0xbb   :  { %v259_v34 = vrot.slane %v258_v33, 4  ;;  %v313_v13 = vadd.f32 %v312_v30, %v311_v32 }
  0xbd   :  { %v260_v35 = vadd.f32 %v259_v34, %v258_v33  ;;  %v314_v36 = vrot.slane %v313_v13, 4 }
  0xbf   :  { %v261_v37 = vrot.slane %v260_v35, 2  ;;  %v315_v38 = vadd.f32 %v314_v36, %v313_v13 }
  0xc1   :  { %v262_v39 = vadd.f32 %v261_v37, %v260_v35  ;;  %v316_v40 = vrot.slane %v315_v38, 2 }
  0xc3   :  { %v263_v41 = vrot.slane %v262_v39, 1  ;;  %v317_v31 = vadd.f32 %v316_v40, %v315_v38 }
  0xc5   :  { %v264_v42 = vadd.f32 %v263_v41, %v262_v39  ;;  %v318_v43 = vrot.slane %v317_v31, 1 }
  0xc7   :  { %266 = vst.msk [vmem:[%s630_s5] sm:$0x1] %vm265_vm3, %v264_v42  ;;  %v319_v44 = vadd.f32 %v318_v43, %v317_v31 }
  0xc9   :  { %320 = vst.msk [vmem:[%s631_s6] sm:$0x1] %vm265_vm3, %v319_v44 }

// kernel: bottleneck_forward.7
= control target key start
LH: loop header
LB: loop body
LE: loop exit
PB: predicated region body
PF: predicated region fallthrough
CT: control target
= control target key end

     0   :  { %9 = vsyncpa [#allocation3], 0  ;;  %s190_s18 = smov [#allocation2]   ;;  %s191_s20 = smov 128   ;;  %s375_s0 = inlined_call_operand.vmem [shape: f32[128,16], index: 0, kind: input, shape index: {}, may-alias: {0,4}]   ;;  %s376_s1 = inlined_call_operand.hbm [shape: f32[128,16], index: 1, kind: input, shape index: {}]   ;;  %s377_s2 = inlined_call_operand.vmem [shape: f32[1,16], index: 2, kind: input, shape index: {}]   ;;  %s378_s3 = inlined_call_operand.vmem [shape: f32[1,16], index: 3, kind: input, shape index: {}]   ;;  %s379_s4 = inlined_call_operand.vmem [shape: f32[128,16], index: 4, kind: output, shape index: {}, may-alias: {0,4}]  }
   0x1   :  { %s16_s17 = sshll.u32 %s376_s1, 4  ;;  %s18_s19 = sshll.u32 %s190_s18, 4  ;;  %s17_s17 = int_to_ptr.hbm [resolvable:$true] %s16_s17  ;;  %s19_s19 = int_to_ptr.vmem [resolvable:$true] %s18_s19 }
   0x2   :  { %s192_s21 = smov 8  }
   0x3   :  { %24 = dma.hbm_to_vmem [thread:$0]  %s17_s17, 2048, %s19_s19, [#allocation3], %s191_s20, %s191_s20, %s192_s21  }
   0x4   :  { %188 = dma.done.wait [#allocation3], 2048  }
   0x5   :  { %189 = vsyncadd [#allocation3], 4294965248  ;;  %v33_v0 = vld [vmem:[%s375_s0] sm:$0xff]  ;;  %v34_v4 = vld [vmem:[%s375_s0 + $0x8] sm:$0xff]  ;;  %vm137_vm0 = vcmask 130048  }
   0x6   :  { %v227_v1 = vld [vmem:[%s377_s2] ss:$0 sm:$0xff]  ;;  %v35_v5 = vld [vmem:[%s375_s0 + $0x10] sm:$0xff]  ;;  %v90_v8 = vld [vmem:[#allocation2 + $0x8] sm:$0xff] }
   0x7   :  { %v232_v2 = vld [vmem:[%s378_s3] ss:$0 sm:$0xff]  ;;  %v53_v3 = vmul.f32 %v227_v1, %v33_v0  ;;  %v54_v7 = vmul.f32 %v227_v1, %v34_v4  ;;  %v55_v9 = vmul.f32 %v227_v1, %v35_v5  ;;  %v36_v10 = vld [vmem:[%s375_s0 + $0x18] sm:$0xff]  ;;  %v91_v12 = vld [vmem:[#allocation2 + $0x10] sm:$0xff] }
   0x8   :  { %v89_v6 = vld [vmem:[#allocation2] sm:$0xff]  ;;  %v56_v13 = vmul.f32 %v227_v1, %v36_v10  ;;  %v38_v15 = vld [vmem:[%s375_s0 + $0x28] sm:$0xff]  ;;  %v92_v18 = vld [vmem:[#allocation2 + $0x18] sm:$0xff] }
   0x9   :  { %v73_v11 = vadd.f32 %v232_v2, %v53_v3  ;;  %v37_v14 = vld [vmem:[%s375_s0 + $0x20] sm:$0xff]  ;;  %v74_v16 = vadd.f32 %v232_v2, %v54_v7  ;;  %v75_v17 = vadd.f32 %v232_v2, %v55_v9  ;;  %v58_v20 = vmul.f32 %v227_v1, %v38_v15  ;;  %v39_v21 = vld [vmem:[%s375_s0 + $0x30] sm:$0xff]  ;;  %v94_v25 = vld [vmem:[#allocation2 + $0x28] sm:$0xff] }
   0xa   :  { %v57_v19 = vmul.f32 %v227_v1, %v37_v14  ;;  %v76_v23 = vadd.f32 %v232_v2, %v56_v13  ;;  %v93_v24 = vld [vmem:[#allocation2 + $0x20] sm:$0xff]  ;;  %v59_v26 = vmul.f32 %v227_v1, %v39_v21  ;;  %v40_v27 = vld [vmem:[%s375_s0 + $0x38] sm:$0xff]  ;;  %v95_v32 = vld [vmem:[#allocation2 + $0x30] sm:$0xff] }
   0xb   :  { %v105_v22 = vadd.f32 %v89_v6, %v73_v11  ;;  %v106_v28 = vadd.f32 %v90_v8, %v74_v16  ;;  %v107_v29 = vadd.f32 %v91_v12, %v75_v17  ;;  %v78_v31 = vadd.f32 %v232_v2, %v58_v20  ;;  %v41_v33 = vld [vmem:[%s375_s0 + $0x40] sm:$0xff]  ;;  %v42_v38 = vld [vmem:[%s375_s0 + $0x48] sm:$0xff]  ;;  %v43_v39 = vld [vmem:[%s375_s0 + $0x50] sm:$0xff] }
   0xc   :  { %v77_v30 = vadd.f32 %v232_v2, %v57_v19  ;;  %v108_v35 = vadd.f32 %v92_v18, %v76_v23  ;;  %v79_v36 = vadd.f32 %v232_v2, %v59_v26  ;;  %v60_v37 = vmul.f32 %v227_v1, %v40_v27  ;;  %v96_v44 = vld [vmem:[#allocation2 + $0x38] sm:$0xff]  ;;  %v97_v54 = vld [vmem:[#allocation2 + $0x40] sm:$0xff]  ;;  %v98_v61 = vld [vmem:[#allocation2 + $0x48] sm:$0xff] }
   0xd   :  { %v121_v34 = vmax.f32 %v105_v22, 0.0  ;;  %v122_v40 = vmax.f32 %v106_v28, 0.0  ;;  %v123_v41 = vmax.f32 %v107_v29, 0.0  ;;  %v110_v43 = vadd.f32 %v94_v25, %v78_v31  ;;  %v44_v45 = vld [vmem:[%s375_s0 + $0x58] sm:$0xff]  ;;  %v99_v62 = vld [vmem:[#allocation2 + $0x50] sm:$0xff]  ;;  %v101_v11 = vld [vmem:[#allocation2 + $0x60] sm:$0xff] }
   0xe   :  { %v109_v42 = vadd.f32 %v93_v24, %v77_v30  ;;  %v124_v46 = vmax.f32 %v108_v35, 0.0  ;;  %v111_v47 = vadd.f32 %v95_v32, %v79_v36  ;;  %v80_v48 = vadd.f32 %v232_v2, %v60_v37  ;;  %v100_v4 = vld [vmem:[#allocation2 + $0x58] sm:$0xff]  ;;  %v102_v12 = vld [vmem:[#allocation2 + $0x68] sm:$0xff]  ;;  %v103_v18 = vld [vmem:[#allocation2 + $0x70] sm:$0xff] }
   0xf   :  { %138 = vst.msk [vmem:[%s379_s4] sm:$0xff] %vm137_vm0, %v121_v34  ;;  %v61_v49 = vmul.f32 %v227_v1, %v41_v33  ;;  %v126_v53 = vmax.f32 %v110_v43, 0.0  ;;  %v62_v55 = vmul.f32 %v227_v1, %v42_v38  ;;  %v63_v56 = vmul.f32 %v227_v1, %v43_v39  ;;  %v104_v27 = vld [vmem:[#allocation2 + $0x78] sm:$0xff] }
  0x10   :  { %v125_v52 = vmax.f32 %v109_v42, 0.0  ;;  %v127_v58 = vmax.f32 %v111_v47, 0.0  ;;  %v112_v59 = vadd.f32 %v96_v44, %v80_v48  ;;  %v64_v63 = vmul.f32 %v227_v1, %v44_v45 }
  0x11   :  { %v81_v60 = vadd.f32 %v232_v2, %v61_v49  ;;  %v82_v0 = vadd.f32 %v232_v2, %v62_v55  ;;  %v83_v3 = vadd.f32 %v232_v2, %v63_v56 }
  0x12   :  { %v128_v8 = vmax.f32 %v112_v59, 0.0  ;;  %v84_v10 = vadd.f32 %v232_v2, %v64_v63 }
  0x13   :  { %v113_v9 = vadd.f32 %v97_v54, %v81_v60  ;;  %v114_v14 = vadd.f32 %v98_v61, %v82_v0  ;;  %v115_v15 = vadd.f32 %v99_v62, %v83_v3 }
  0x14   :  { %v116_v20 = vadd.f32 %v100_v4, %v84_v10 }
  0x15   :  { %v129_v19 = vmax.f32 %v113_v9, 0.0  ;;  %v130_v23 = vmax.f32 %v114_v14, 0.0  ;;  %v131_v24 = vmax.f32 %v115_v15, 0.0 }
  0x16   :  { %v45_v50 = vld [vmem:[%s375_s0 + $0x60] sm:$0xff]  ;;  %v46_v51 = vld [vmem:[%s375_s0 + $0x68] sm:$0xff]  ;;  %v132_v28 = vmax.f32 %v116_v20, 0.0 }
  0x17   :  { %139 = vst.msk [vmem:[%s379_s4 + $0x8] sm:$0xff] %vm137_vm0, %v122_v40  ;;  %v65_v5 = vmul.f32 %v227_v1, %v45_v50  ;;  %v66_v6 = vmul.f32 %v227_v1, %v46_v51 }
  0x19   :  { %v85_v16 = vadd.f32 %v232_v2, %v65_v5  ;;  %v86_v17 = vadd.f32 %v232_v2, %v66_v6 }
  0x1b   :  { %v117_v25 = vadd.f32 %v101_v11, %v85_v16  ;;  %v118_v26 = vadd.f32 %v102_v12, %v86_v17 }
  0x1d   :  { %v134_v31 = vmax.f32 %v118_v26, 0.0 }
  0x1e   :  { %v47_v57 = vld [vmem:[%s375_s0 + $0x70] sm:$0xff] }
  0x1f   :  { %140 = vst.msk [vmem:[%s379_s4 + $0x10] sm:$0xff] %vm137_vm0, %v123_v41  ;;  %v67_v13 = vmul.f32 %v227_v1, %v47_v57 }
  0x20   :  { %141 = vst.msk [vmem:[%s379_s4 + $0x18] sm:$0xff] %vm137_vm0, %v124_v46 }
  0x21   :  { %v87_v21 = vadd.f32 %v232_v2, %v67_v13 }
  0x23   :  { %v119_v29 = vadd.f32 %v103_v18, %v87_v21 }
  0x25   :  { %v135_v32 = vmax.f32 %v119_v29, 0.0 }
  0x27   :  { %v48_v7 = vld [vmem:[%s375_s0 + $0x78] sm:$0xff] }
  0x28   :  { %142 = vst.msk [vmem:[%s379_s4 + $0x20] sm:$0xff] %vm137_vm0, %v125_v52  ;;  %v68_v22 = vmul.f32 %v227_v1, %v48_v7  ;;  %v133_v1 = vmax.f32 %v117_v25, 0.0 }
  0x29   :  { %143 = vst.msk [vmem:[%s379_s4 + $0x28] sm:$0xff] %vm137_vm0, %v126_v53 }
  0x2a   :  { %144 = vst.msk [vmem:[%s379_s4 + $0x30] sm:$0xff] %vm137_vm0, %v127_v58  ;;  %v88_v30 = vadd.f32 %v232_v2, %v68_v22 }
  0x2b   :  { %145 = vst.msk [vmem:[%s379_s4 + $0x38] sm:$0xff] %vm137_vm0, %v128_v8 }
  0x2c   :  { %146 = vst.msk [vmem:[%s379_s4 + $0x40] sm:$0xff] %vm137_vm0, %v129_v19  ;;  %v120_v33 = vadd.f32 %v104_v27, %v88_v30 }
  0x2d   :  { %147 = vst.msk [vmem:[%s379_s4 + $0x48] sm:$0xff] %vm137_vm0, %v130_v23 }
  0x2e   :  { %148 = vst.msk [vmem:[%s379_s4 + $0x50] sm:$0xff] %vm137_vm0, %v131_v24  ;;  %v136_v2 = vmax.f32 %v120_v33, 0.0 }
  0x2f   :  { %149 = vst.msk [vmem:[%s379_s4 + $0x58] sm:$0xff] %vm137_vm0, %v132_v28 }
  0x30   :  { %150 = vst.msk [vmem:[%s379_s4 + $0x60] sm:$0xff] %vm137_vm0, %v133_v1 }
  0x31   :  { %151 = vst.msk [vmem:[%s379_s4 + $0x68] sm:$0xff] %vm137_vm0, %v134_v31 }
  0x32   :  { %152 = vst.msk [vmem:[%s379_s4 + $0x70] sm:$0xff] %vm137_vm0, %v135_v32 }
  0x33   :  { %153 = vst.msk [vmem:[%s379_s4 + $0x78] sm:$0xff] %vm137_vm0, %v136_v2 }
  0x34   :  { %158 = vsyncpa [#allocation3], 1 }

// kernel: bottleneck_forward.5
= control target key start
LH: loop header
LB: loop body
LE: loop exit
PB: predicated region body
PF: predicated region fallthrough
CT: control target
= control target key end

     0   :  { %s1106_s21 = smov 0   ;;  %s1477_s0 = inlined_call_operand.vmem [shape: f32[2,8,8,4], index: 0, kind: input, shape index: {}]   ;;  %s1478_s1 = inlined_call_operand.vmem [shape: f32[36,4], index: 1, kind: input, shape index: {}]   ;;  %s1479_s2 = inlined_call_operand.vmem [shape: f32[1,4], index: 2, kind: input, shape index: {}]   ;;  %s1480_s3 = inlined_call_operand.vmem [shape: f32[1,4], index: 3, kind: input, shape index: {}]   ;;  %s1481_s4 = inlined_call_operand.vmem [shape: f32[2,64,4], index: 4, kind: output, shape index: {0}]   ;;  %s1482_s5 = inlined_call_operand.vmem [shape: f32[2,1,4], index: 5, kind: output, shape index: {1}]   ;;  %s1483_s6 = inlined_call_operand.vmem [shape: f32[2,1,4], index: 6, kind: output, shape index: {2}]  }
   0x1 LB: > { %s998_s22 = sadd.s32 4294967295, %s1060_s21   ;;  %p1002_p0 = scmp.ge.s32.totalorder %s1060_s21, 1  ;;  %s1060_s21 = sphi %s1106_s21, %s17_s21  }
   0x2   : > { %p217_p1 = scmp.lt.s32.totalorder %s1060_s21, 3 }
   0x4   : > { %p218_p2 = pnand %p1002_p0, %p217_p1 }
   0x5   : > { %p253_p3 = scmp.lt.s32.totalorder (!%p218_p2), %s998_s22, 1  ;;  %s1063_s7 = smov (!%p218_p2), 4  }
   0x6   : > { %221 = sbr.rel (%p218_p2) target bundleno = 475 (0x1db), region = 36  ;;  %s1064_s8 = smov (!%p218_p2), 8  }
   0x7   : > { %s1065_s9 = smov (!%p218_p2), 12   ;;  %s1066_s10 = smov (!%p218_p2), 16  }
   0x8   : > { %s1067_s11 = smov (!%p218_p2), 20   ;;  %s1068_s12 = smov (!%p218_p2), 24  }
   0x9   : > { %s1069_s13 = smov (!%p218_p2), 28   ;;  %s1070_s14 = smov (!%p218_p2), 32  }
   0xb   : > { %vm309_vm0 = vcmask 31744   ;;  %vm311_vm1 = vcmask 25600   ;;  %v1062_v0 = vmov 0.0   ;;  %s1485_s22 = smov (!%p253_p3, %s998_s22), 1  ;;  %v1125_v1 = vld [vmem:[%s1479_s2] ss:$0 sm:$0xff] }
   0xc   : > { %310 = vst.msk [vmem:[#allocation2] sm:$0xff] %vm309_vm0, %v1062_v0  ;;  %s1018_s23 = sshll.u32 %s1485_s22, 6  ;;  %v1145_v7 = vld [vmem:[%s1480_s3] ss:$0 sm:$0xff]  ;;  %vm396_vm2 = vcmask 64544   ;;  %vm445_vm3 = vcmask 97344  }
   0xd   : > { %312 = vst.msk [vmem:[#allocation2 + $0x8] sm:$0x3] %vm311_vm1, %v1062_v0  ;;  %s1133_s28 = scalar_lea.vmem %s1477_s0, %s1018_s23  ;;  %vm494_vm4 = vcmask 130144   ;;  %vm543_vm5 = vcmask 162944   ;;  %vm592_vm6 = vcmask 195744   ;;  %vm642_vm7 = vcmask 228544   ;;  %s1432_s30 = scalar_lea.vmem %s1481_s4, %s1018_s23 }
   0xe   : > { %313 = vst.msk [vmem:[#allocation2 + $0x10] sm:$0xff] %vm309_vm0, %v1062_v0  ;;  %v274_v2 = vld [vmem:[%s1133_s28 + $0x18] sm:$0xff]  ;;  %v272_v3 = vld [vmem:[%s1133_s28 + $0x8] sm:$0xff]  ;;  %v271_v4 = vld [vmem:[%s1133_s28] sm:$0xff]  ;;  %vm787_vm8 = vcmask 1043456   ;;  %vm691_vm9 = vcmask 261344  }
   0xf   : > { %314 = vst.msk [vmem:[#allocation2 + $0x18] sm:$0x3] %vm311_vm1, %v1062_v0  ;;  %v285_v6 = vmul.f32 %v1125_v1, %v274_v2  ;;  %v275_v8 = vld [vmem:[%s1133_s28 + $0x20] sm:$0xff]  ;;  %v283_v9 = vmul.f32 %v1125_v1, %v272_v3  ;;  %v276_v10 = vld [vmem:[%s1133_s28 + $0x28] sm:$0xff]  ;;  %v282_v11 = vmul.f32 %v1125_v1, %v271_v4  ;;  %v273_v16 = vld [vmem:[%s1133_s28 + $0x10] sm:$0xff]  ;;  %vm740_vm10 = vcmask 294144  }
  0x10   : > { %315 = vst.msk [vmem:[#allocation2 + $0x20] sm:$0xff] %vm309_vm0, %v1062_v0  ;;  %v286_v12 = vmul.f32 %v1125_v1, %v275_v8  ;;  %v287_v14 = vmul.f32 %v1125_v1, %v276_v10  ;;  %v284_v19 = vmul.f32 %v1125_v1, %v273_v16  ;;  %v277_v29 = vld [vmem:[%s1133_s28 + $0x30] sm:$0xff]  ;;  %v278_v50 = vld [vmem:[%s1133_s28 + $0x38] sm:$0xff]  ;;  %v757_v16 = vld [vmem:[%s1478_s1] sm:$0xff]  ;;  %vm762_vm11 = vcmask 293888  }
  0x11   : > { %316 = vst.msk [vmem:[#allocation2 + $0x28] sm:$0x3] %vm311_vm1, %v1062_v0  ;;  %v296_v13 = vadd.f32 %v1145_v7, %v285_v6  ;;  %v294_v15 = vadd.f32 %v1145_v7, %v283_v9  ;;  %v293_v18 = vadd.f32 %v1145_v7, %v282_v11  ;;  %v288_v30 = vmul.f32 %v1125_v1, %v277_v29  ;;  %v761_v9 = vld [vmem:[%s1478_s1 + $0x20] sm:$0xf] }
  0x12   : > { %317 = vst.msk [vmem:[#allocation2 + $0x30] sm:$0xff] %vm309_vm0, %v1062_v0  ;;  %v297_v20 = vadd.f32 %v1145_v7, %v286_v12  ;;  %v298_v22 = vadd.f32 %v1145_v7, %v287_v14  ;;  %v295_v24 = vadd.f32 %v1145_v7, %v284_v19  ;;  %v289_v51 = vmul.f32 %v1125_v1, %v278_v50  ;;  %v759_v14 = vld [vmem:[%s1478_s1 + $0x10] sm:$0xff] }
  0x13   : > { %318 = vst.msk [vmem:[#allocation2 + $0x38] sm:$0x3] %vm311_vm1, %v1062_v0  ;;  %v304_v21 = vmax.f32 %v296_v13, 0.0  ;;  %v302_v23 = vmax.f32 %v294_v15, 0.0  ;;  %v301_v25 = vmax.f32 %v293_v18, 0.0  ;;  %v299_v34 = vadd.f32 %v1145_v7, %v288_v30  ;;  %v340_v58 = vld [vmem:[#allocation2] sm:$0xff]  ;;  %1007 = vmatpush.msk.msra.mxu0 %vm787_vm8, %v761_v9  ;;  %1021 = vmatpush.msk.msra.mxu2 %vm787_vm8, %v761_v9 }
  0x14   : > { %v356_v5 = vld [vmem:[#allocation2 + $0x1] sm:$0xff]  ;;  %319 = vst.msk [vmem:[#allocation2 + $0x40] sm:$0xff] %vm309_vm0, %v1062_v0  ;;  %v305_v26 = vmax.f32 %v297_v20, 0.0  ;;  %v306_v27 = vmax.f32 %v298_v22, 0.0  ;;  %v303_v28 = vmax.f32 %v295_v24, 0.0  ;;  %v300_v52 = vadd.f32 %v1145_v7, %v289_v51  ;;  %1020 = vmatpush.msk.msra.mxu1 %vm787_vm8, %v761_v9  ;;  %v760_v13 = vld [vmem:[%s1478_s1 + $0x18] sm:$0xff]  ;;  %1022 = vmatpush.msk.msra.mxu3 %vm787_vm8, %v761_v9 }
  0x15   : > { %372 = vrot.lane.b32.xlu0 %v356_v5, %s1063_s7  ;;  %320 = vst.msk [vmem:[#allocation2 + $0x48] sm:$0x3] %vm311_vm1, %v1062_v0  ;;  %v405_v17 = vld [vmem:[#allocation2 + $0x2] sm:$0xff]  ;;  %v307_v37 = vmax.f32 %v299_v34, 0.0  ;;  %803 = vmatpush.msra.mxu0 %v760_v13  ;;  %vm861_vm12 = vcmask 24576  }
  0x16   : > { %321 = vst.msk [vmem:[#allocation2 + $0x50] sm:$0xff] %vm309_vm0, %v1062_v0  ;;  %v308_v53 = vmax.f32 %v300_v52, 0.0  ;;  %1024 = vmatpush.msra.mxu2 %v760_v13  ;;  %1023 = vmatpush.msra.mxu1 %v760_v13  ;;  %v758_v15 = vld [vmem:[%s1478_s1 + $0x8] sm:$0xff] }
  0x17   : > { %322 = vst.msk [vmem:[#allocation2 + $0x58] sm:$0x3] %vm311_vm1, %v1062_v0  ;;  %1025 = vmatpush.msra.mxu3 %v760_v13  ;;  %804 = vmatpush.msra.mxu0 %v759_v14 }
  0x18   : > { %323 = vst.msk [vmem:[#allocation2 + $0x60] sm:$0xff] %vm309_vm0, %v1062_v0  ;;  %1027 = vmatpush.msra.mxu2 %v759_v14  ;;  %1026 = vmatpush.msra.mxu1 %v759_v14 }
  0x19   : > { %324 = vst.msk [vmem:[#allocation2 + $0x68] sm:$0x3] %vm311_vm1, %v1062_v0  ;;  %1028 = vmatpush.msra.mxu3 %v759_v14  ;;  %805 = vmatpush.msra.mxu0 %v758_v15 }
  0x1a   : > { %325 = vst.msk [vmem:[#allocation2 + $0x70] sm:$0xff] %vm309_vm0, %v1062_v0  ;;  %1030 = vmatpush.msra.mxu2 %v758_v15  ;;  %1029 = vmatpush.msra.mxu1 %v758_v15 }
  0x1b   : > { %326 = vst.msk [vmem:[#allocation2 + $0x78] sm:$0x3] %vm311_vm1, %v1062_v0  ;;  %806 = vmatpush.msra.mxu0 %v757_v16  ;;  %1031 = vmatpush.msra.mxu3 %v758_v15 }
  0x1c   : > { %327 = vst.msk [vmem:[#allocation2 + $0x80] sm:$0xff] %vm309_vm0, %v1062_v0  ;;  %1033 = vmatpush.msra.mxu2 %v757_v16  ;;  %1032 = vmatpush.msra.mxu1 %v757_v16 }
  0x1d   : > { %328 = vst.msk [vmem:[#allocation2 + $0x88] sm:$0x3] %vm311_vm1, %v1062_v0  ;;  %421 = vrot.lane.b32.xlu0 %v405_v17, %s1064_s8  ;;  %1034 = vmatpush.msra.mxu3 %v757_v16 }
  0x1e   : > { %329 = vst.msk [vmem:[#allocation2 + $0x90] sm:$0xff] %vm309_vm0, %v1062_v0 }
  0x1f   : > { %330 = vst.msk [vmem:[#allocation2 + $0x98] sm:$0x3] %vm311_vm1, %v1062_v0 }
  0x20   : > { %335 = vst.msk [vmem:[#allocation2 + $0x41] sm:$0xff] %vm309_vm0, %v304_v21 }
  0x21   : > { %333 = vst.msk [vmem:[#allocation2 + $0x21] sm:$0xff] %vm309_vm0, %v302_v23 }
  0x22   : > { %332 = vst.msk [vmem:[#allocation2 + $0x11] sm:$0xff] %vm309_vm0, %v301_v25 }
  0x23   : > { %336 = vst.msk [vmem:[#allocation2 + $0x51] sm:$0xff] %vm309_vm0, %v305_v26 }
  0x24   : > { %337 = vst.msk [vmem:[#allocation2 + $0x61] sm:$0xff] %vm309_vm0, %v306_v27 }
  0x25   : > { %334 = vst.msk [vmem:[#allocation2 + $0x31] sm:$0xff] %vm309_vm0, %v303_v28  ;;  %v609_v20 = vld [vmem:[#allocation2 + $0x90] sm:$0xff] }
  0x26   : > { %338 = vst.msk [vmem:[#allocation2 + $0x71] sm:$0xff] %vm309_vm0, %v307_v37  ;;  %v707_v24 = vld [vmem:[#allocation2 + $0x92] sm:$0xff] }
  0x27   : > { %v1182_v31 = vld [vmem:[#allocation2 + $0x41] sm:$0xff]  ;;  %339 = vst.msk [vmem:[#allocation2 + $0x81] sm:$0xff] %vm309_vm0, %v308_v53  ;;  %v658_v28 = vld [vmem:[#allocation2 + $0x91] sm:$0xff] }
  0x28   : > { %v1184_v32 = vld [vmem:[#allocation2 + $0x42] sm:$0xff]  ;;  %380 = vrot.lane.b32.xlu1 %v1182_v31, %s1063_s7  ;;  %348 = vst.msk [vmem:[#allocation3] sm:$0xff] %vm309_vm0, %v340_v58 }
  0x29   : > { %v1188_v33 = vld [vmem:[#allocation2 + $0x21] sm:$0xff]  ;;  %429 = vrot.lane.b32.xlu2 %v1184_v32, %s1064_s8  ;;  %v454_v35 = vld [vmem:[#allocation2 + $0x10] sm:$0xff] }
  0x2a   : > { %376 = vrot.lane.b32.xlu0 %v1188_v33, %s1063_s7  ;;  %v1195_v36 = vld [vmem:[#allocation2 + $0x50] sm:$0xff]  ;;  %349 = vst.msk [vmem:[#allocation3 + $0x8] sm:$0xff] %vm309_vm0, %v454_v35  ;;  %v1207_v41 = vld [vmem:[#allocation2 + $0x22] sm:$0xff] }
  0x2b   : > { %353 = vst.msk [vmem:[#allocation3 + $0x28] sm:$0xff] %vm309_vm0, %v1195_v36  ;;  %v1200_v38 = vld [vmem:[#allocation2 + $0x60] sm:$0xff]  ;;  %v503_v40 = vld [vmem:[#allocation2 + $0x11] sm:$0xff] }
  0x2c   : > { %v1203_v39 = vld [vmem:[#allocation2 + $0x30] sm:$0xff]  ;;  %354 = vst.msk [vmem:[#allocation3 + $0x30] sm:$0xff] %vm309_vm0, %v1200_v38  ;;  %v1219_v44 = vld [vmem:[#allocation2 + $0x61] sm:$0xff] }
  0x2d   : > { %351 = vst.msk [vmem:[#allocation3 + $0x18] sm:$0xff] %vm309_vm0, %v1203_v39  ;;  %v1215_v42 = vld [vmem:[#allocation2 + $0x70] sm:$0xff]  ;;  %v602_v45 = vld [vmem:[#allocation2 + $0x20] sm:$0xff] }
  0x2e   : > { %355 = vst.msk [vmem:[#allocation3 + $0x38] sm:$0xff] %vm309_vm0, %v1215_v42  ;;  %v552_v43 = vld [vmem:[#allocation2 + $0x12] sm:$0xff]  ;;  %v1242_v48 = vld [vmem:[#allocation2 + $0x62] sm:$0xff] }
  0x2f   : > { %350 = vst.msk [vmem:[#allocation3 + $0x10] sm:$0xff] %vm309_vm0, %v602_v45  ;;  %v1227_v46 = vld [vmem:[#allocation2 + $0x51] sm:$0xff]  ;;  %v604_v55 = vld [vmem:[#allocation2 + $0x40] sm:$0xff] }
  0x30   : > { %470 = vrot.lane.b32.xlu1 %v454_v35, %s1065_s9  ;;  %v1234_v47 = vld [vmem:[#allocation2 + $0x52] sm:$0xff]  ;;  %352 = vst.msk [vmem:[#allocation3 + $0x20] sm:$0xff] %vm309_vm0, %v604_v55  ;;  %v1284_v59 = vld [vmem:[#allocation2 + $0x80] sm:$0xff] }
  0x31   : > { %519 = vrot.lane.b32.xlu2 %v503_v40, %s1066_s10  ;;  %v1244_v49 = vld [vmem:[#allocation2 + $0x31] sm:$0xff]  ;;  %v1286_v60 = vld [vmem:[#allocation2 + $0x81] sm:$0xff] }
  0x32   : > { %425 = vrot.lane.b32.xlu0 %v1207_v41, %s1064_s8  ;;  %v554_v54 = vld [vmem:[#allocation2 + $0x32] sm:$0xff]  ;;  %v1306_v2 = vld [vmem:[#allocation2 + $0x82] sm:$0xff] }
  0x33   : > { %v509_v56 = vld [vmem:[#allocation2 + $0x71] sm:$0xff] }
  0x34   : > { %v1266_v57 = vld [vmem:[#allocation2 + $0x72] sm:$0xff] }
  0x38   : > { %478 = vrot.lane.b32.xlu1 %v1195_v36, %s1065_s9 }
  0x39   : > { %568 = vrot.lane.b32.xlu2 %v552_v43, %s1067_s11 }
  0x3a   : > { %384 = vrot.lane.b32.xlu0 %v1219_v44, %s1063_s7 }
  0x40   : > { %527 = vrot.lane.b32.xlu1 %v1227_v46, %s1066_s10 }
  0x41   : > { %618 = vrot.lane.b32.xlu2 %v602_v45, %s1068_s12 }
  0x42   : > { %667 = vrot.lane.b32.xlu0 %v1188_v33, %s1069_s13 }
  0x48   : > { %474 = vrot.lane.b32.xlu1 %v1203_v39, %s1065_s9 }
  0x49   : > { %576 = vrot.lane.b32.xlu2 %v1234_v47, %s1067_s11 }
  0x4a   : > { %626 = vrot.lane.b32.xlu0 %v1200_v38, %s1068_s12 }
  0x50   : > { %433 = vrot.lane.b32.xlu1 %v1242_v48, %s1064_s8 }
  0x51   : > { %523 = vrot.lane.b32.xlu2 %v1244_v49, %s1066_s10 }
  0x52   : > { %482 = vrot.lane.b32.xlu0 %v1215_v42, %s1065_s9 }
  0x58   : > { %716 = vrot.lane.b32.xlu1 %v1207_v41, %s1070_s14 }
  0x59   : > { %374 = vrot.lane.b32.xlu2 %v503_v40, %s1063_s7 }
  0x5a   : > { %423 = vrot.lane.b32.xlu0 %v552_v43, %s1064_s8 }
  0x60   : > { %572 = vrot.lane.b32.xlu1 %v554_v54, %s1067_s11 }
  0x61   : > { %675 = vrot.lane.b32.xlu2 %v1219_v44, %s1069_s13 }
  0x62   : > { %724 = vrot.lane.b32.xlu0 %v1242_v48, %s1070_s14 }
  0x68   : > { %531 = vrot.lane.b32.xlu1 %v509_v56, %s1066_s10 }
  0x69   : > { %622 = vrot.lane.b32.xlu2 %v604_v55, %s1068_s12 }
  0x6a   : > { %580 = vrot.lane.b32.xlu0 %v1266_v57, %s1067_s11 }
  0x70   : > { %382 = vrot.lane.b32.xlu1 %v1227_v46, %s1063_s7 }
  0x71   : > { %472 = vrot.lane.b32.xlu2 %v602_v45, %s1065_s9 }
  0x72   : > { %521 = vrot.lane.b32.xlu0 %v1188_v33, %s1066_s10 }
  0x78   : > { %671 = vrot.lane.b32.xlu1 %v1182_v31, %s1069_s13 }
  0x79   : > { %431 = vrot.lane.b32.xlu2 %v1234_v47, %s1064_s8 }
  0x7a   : > { %378 = vrot.lane.b32.xlu0 %v1244_v49, %s1063_s7 }
  0x80   : > { %630 = vrot.lane.b32.xlu1 %v1284_v59, %s1068_s12 }
  0x81   : > { %720 = vrot.lane.b32.xlu2 %v1184_v32, %s1070_s14 }
  0x82   : > { %679 = vrot.lane.b32.xlu0 %v1286_v60, %s1069_s13 }
  0x83   : > { %v430_v61 = vpop.permute.xlu2 %429 }
  0x87   : > { %v373_v62 = vpop.permute.xlu0 %372 }
  0x88   : > { %480 = vrot.lane.b32.xlu1 %v1200_v38, %s1065_s9  ;;  %397 = vst.msk [vmem:[#allocation3] sm:$0xff] %vm396_vm2, %v373_v62 }
  0x89   : > { %570 = vrot.lane.b32.xlu2 %v1207_v41, %s1067_s11 }
  0x8a   : > { %620 = vrot.lane.b32.xlu0 %v1203_v39, %s1068_s12 }
  0x8b   : > { %v520_v63 = vpop.permute.xlu2 %519 }
  0x8f   : > { %v422_v0 = vpop.permute.xlu0 %421 }
  0x90   : > { %427 = vrot.lane.b32.xlu1 %v554_v54, %s1064_s8  ;;  %446 = vst.msk [vmem:[#allocation3] sm:$0xff] %vm445_vm3, %v422_v0 }
  0x91   : > { %529 = vrot.lane.b32.xlu2 %v1219_v44, %s1066_s10 }
  0x92   : > { %476 = vrot.lane.b32.xlu0 %v604_v55, %s1065_s9 }
  0x93   : > { %v569_v1 = vpop.permute.xlu2 %568 }
  0x98   : > { %728 = vrot.lane.b32.xlu1 %v1306_v2, %s1070_s14 }
  0x99   : > { %386 = vrot.lane.b32.xlu2 %v509_v56, %s1063_s7 }
  0x9a   : > { %435 = vrot.lane.b32.xlu0 %v1266_v57, %s1064_s8  ;;  %v381_v3 = vpop.permute.xlu1 %380  ;;  %s265_s8 = scalar_lea.vmem %s1482_s5, %s1485_s22 }
  0x9b   : > { %v619_v4 = vpop.permute.xlu2 %618  ;;  %401 = vst.msk [vmem:[#allocation3 + $0x20] sm:$0xff] %vm396_vm2, %v381_v3 }
  0x9c   : > { %v377_v5 = vpop.permute.xlu0 %376  ;;  %450 = vst.msk [vmem:[#allocation3 + $0x20] sm:$0xff] %vm445_vm3, %v430_v61 }
  0x9d   : > { %399 = vst.msk [vmem:[#allocation3 + $0x10] sm:$0xff] %vm396_vm2, %v377_v5 }
  0xa0   : > { %578 = vrot.lane.b32.xlu1 %v1242_v48, %s1067_s11 }
  0xa1   : > { %669 = vrot.lane.b32.xlu2 %v1244_v49, %s1069_s13 }
  0xa2   : > { %718 = vrot.lane.b32.xlu0 %v554_v54, %s1070_s14  ;;  %v471_v6 = vpop.permute.xlu1 %470 }
  0xa3   : > { %v577_v7 = vpop.permute.xlu2 %576  ;;  %495 = vst.msk [vmem:[#allocation3] sm:$0xff] %vm494_vm4, %v471_v6 }
  0xa4   : > { %v426_v8 = vpop.permute.xlu0 %425  ;;  %544 = vst.msk [vmem:[#allocation3] sm:$0xff] %vm543_vm5, %v520_v63 }
  0xa5   : > { %448 = vst.msk [vmem:[#allocation3 + $0x10] sm:$0xff] %vm445_vm3, %v426_v8 }
  0xa6   : > { %593 = vst.msk [vmem:[#allocation3] sm:$0xff] %vm592_vm6, %v569_v1 }
  0xa7   : > { %643 = vst.msk [vmem:[#allocation3] sm:$0xff] %vm642_vm7, %v619_v4 }
  0xa8   : > { %525 = vrot.lane.b32.xlu1 %v1182_v31, %s1066_s10 }
  0xa9   : > { %628 = vrot.lane.b32.xlu2 %v1215_v42, %s1068_s12 }
  0xaa   : > { %677 = vrot.lane.b32.xlu0 %v509_v56, %s1069_s13  ;;  %v479_v10 = vpop.permute.xlu1 %478 }
  0xab   : > { %v524_v11 = vpop.permute.xlu2 %523  ;;  %499 = vst.msk [vmem:[#allocation3 + $0x20] sm:$0xff] %vm494_vm4, %v479_v10 }
  0xac   : > { %v385_v12 = vpop.permute.xlu0 %384 }
  0xad   : > { %403 = vst.msk [vmem:[#allocation3 + $0x30] sm:$0xff] %vm396_vm2, %v385_v12 }
  0xb0   : > { %484 = vrot.lane.b32.xlu1 %v1284_v59, %s1065_s9 }
  0xb1   : > { %574 = vrot.lane.b32.xlu2 %v1184_v32, %s1067_s11 }
  0xb2   : > { %726 = vrot.lane.b32.xlu0 %v1266_v57, %s1070_s14  ;;  %v528_v17 = vpop.permute.xlu1 %527 }
  0xb3   : > { %v375_v18 = vpop.permute.xlu2 %374  ;;  %548 = vst.msk [vmem:[#allocation3 + $0x20] sm:$0xff] %vm543_vm5, %v528_v17 }
  0xb4   : > { %v668_v19 = vpop.permute.xlu0 %667  ;;  %597 = vst.msk [vmem:[#allocation3 + $0x20] sm:$0xff] %vm592_vm6, %v577_v7 }
  0xb5   : > { %692 = vst.msk [vmem:[#allocation3] sm:$0xff] %vm691_vm9, %v668_v19 }
  0xb6   : > { %398 = vst.msk [vmem:[#allocation3 + $0x8] sm:$0xff] %vm396_vm2, %v375_v18 }
  0xb8   : > { %533 = vrot.lane.b32.xlu1 %v1286_v60, %s1066_s10 }
  0xb9   : > { %624 = vrot.lane.b32.xlu2 %v1195_v36, %s1068_s12 }
  0xba   : > { %632 = vrot.lane.b32.xlu0 %v609_v20, %s1068_s12  ;;  %v475_v21 = vpop.permute.xlu1 %474 }
  0xbb   : > { %v676_v22 = vpop.permute.xlu2 %675  ;;  %497 = vst.msk [vmem:[#allocation3 + $0x10] sm:$0xff] %vm494_vm4, %v475_v21 }
  0xbc   : > { %v627_v23 = vpop.permute.xlu0 %626  ;;  %546 = vst.msk [vmem:[#allocation3 + $0x10] sm:$0xff] %vm543_vm5, %v524_v11 }
  0xbd   : > { %647 = vst.msk [vmem:[#allocation3 + $0x20] sm:$0xff] %vm642_vm7, %v627_v23 }
  0xbe   : > { %696 = vst.msk [vmem:[#allocation3 + $0x20] sm:$0xff] %vm691_vm9, %v676_v22 }
  0xc0   : > { %582 = vrot.lane.b32.xlu1 %v1306_v2, %s1067_s11  ;;  %s268_s11 = scalar_lea.vmem %s1483_s6, %s1485_s22 }
  0xc1   : > { %673 = vrot.lane.b32.xlu2 %v1227_v46, %s1069_s13 }
  0xc2   : > { %730 = vrot.lane.b32.xlu0 %v707_v24, %s1070_s14  ;;  %v434_v25 = vpop.permute.xlu1 %433 }
  0xc3   : > { %v623_v26 = vpop.permute.xlu2 %622  ;;  %452 = vst.msk [vmem:[#allocation3 + $0x30] sm:$0xff] %vm445_vm3, %v434_v25 }
  0xc4   : > { %v483_v27 = vpop.permute.xlu0 %482 }
  0xc5   : > { %501 = vst.msk [vmem:[#allocation3 + $0x30] sm:$0xff] %vm494_vm4, %v483_v27 }
  0xc8   : > { %722 = vrot.lane.b32.xlu1 %v1234_v47, %s1070_s14 }
  0xc9   : > { %681 = vrot.lane.b32.xlu2 %v658_v28, %s1069_s13 }
  0xca   : > { %v717_v29 = vpop.permute.xlu1 %716 }
  0xcb   : > { %v473_v30 = vpop.permute.xlu2 %472  ;;  %741 = vst.msk [vmem:[#allocation3] sm:$0xff] %vm740_vm10, %v717_v29 }
  0xcc   : > { %v424_v31 = vpop.permute.xlu0 %423 }
  0xcd   : > { %447 = vst.msk [vmem:[#allocation3 + $0x8] sm:$0xff] %vm445_vm3, %v424_v31 }
  0xce   : > { %496 = vst.msk [vmem:[#allocation3 + $0x8] sm:$0xff] %vm494_vm4, %v473_v30 }
  0xd2   : > { %v573_v32 = vpop.permute.xlu1 %572  ;;  %v749_v33 = vld [vmem:[#allocation3] sm:$0xff] }
  0xd3   : > { %v432_v34 = vpop.permute.xlu2 %431  ;;  %595 = vst.msk [vmem:[#allocation3 + $0x10] sm:$0xff] %vm592_vm6, %v573_v32  ;;  %1008 = vmatmul.msk.f32.vlgmr.msra.gmra.mxu0 %vm762_vm11, %v749_v33 }
  0xd4   : > { %v725_v35 = vpop.permute.xlu0 %724  ;;  %645 = vst.msk [vmem:[#allocation3 + $0x10] sm:$0xff] %vm642_vm7, %v623_v26 }
  0xd5   : > { %745 = vst.msk [vmem:[#allocation3 + $0x20] sm:$0xff] %vm740_vm10, %v725_v35 }
  0xda   : > { %v532_v36 = vpop.permute.xlu1 %531 }
  0xdb   : > { %v721_v37 = vpop.permute.xlu2 %720  ;;  %550 = vst.msk [vmem:[#allocation3 + $0x30] sm:$0xff] %vm543_vm5, %v532_v36 }
  0xdc   : > { %v581_v38 = vpop.permute.xlu0 %580  ;;  %v753_v39 = vld [vmem:[#allocation3 + $0x20] sm:$0xff] }
  0xdd   : > { %599 = vst.msk [vmem:[#allocation3 + $0x30] sm:$0xff] %vm592_vm6, %v581_v38  ;;  %1012 = vmatmul.msk.f32.vlgmr.msra.gmra.mxu2 %vm762_vm11, %v753_v39 }
  0xe2   : > { %v383_v40 = vpop.permute.xlu1 %382 }
  0xe3   : > { %v571_v41 = vpop.permute.xlu2 %570  ;;  %402 = vst.msk [vmem:[#allocation3 + $0x28] sm:$0xff] %vm396_vm2, %v383_v40 }
  0xe4   : > { %v522_v42 = vpop.permute.xlu0 %521  ;;  %451 = vst.msk [vmem:[#allocation3 + $0x28] sm:$0xff] %vm445_vm3, %v432_v34 }
  0xe5   : > { %545 = vst.msk [vmem:[#allocation3 + $0x8] sm:$0xff] %vm543_vm5, %v522_v42 }
  0xe6   : > { %594 = vst.msk [vmem:[#allocation3 + $0x8] sm:$0xff] %vm592_vm6, %v571_v41 }
  0xea   : > { %v672_v43 = vpop.permute.xlu1 %671 }
  0xeb   : > { %v530_v44 = vpop.permute.xlu2 %529  ;;  %694 = vst.msk [vmem:[#allocation3 + $0x10] sm:$0xff] %vm691_vm9, %v672_v43 }
  0xec   : > { %v379_v45 = vpop.permute.xlu0 %378  ;;  %743 = vst.msk [vmem:[#allocation3 + $0x10] sm:$0xff] %vm740_vm10, %v721_v37 }
  0xed   : > { %400 = vst.msk [vmem:[#allocation3 + $0x18] sm:$0xff] %vm396_vm2, %v379_v45 }
  0xf2   : > { %v631_v46 = vpop.permute.xlu1 %630 }
  0xf3   : > { %v387_v47 = vpop.permute.xlu2 %386  ;;  %649 = vst.msk [vmem:[#allocation3 + $0x30] sm:$0xff] %vm642_vm7, %v631_v46  ;;  %v751_v49 = vld [vmem:[#allocation3 + $0x10] sm:$0xff] }
  0xf4   : > { %v680_v48 = vpop.permute.xlu0 %679  ;;  %1010 = vmatmul.msk.f32.vlgmr.msra.gmra.mxu1 %vm762_vm11, %v751_v49  ;;  %404 = vst.msk [vmem:[#allocation3 + $0x38] sm:$0xff] %vm396_vm2, %v387_v47 }
  0xf5   : > { %698 = vst.msk [vmem:[#allocation3 + $0x30] sm:$0xff] %vm691_vm9, %v680_v48 }
  0xfa   : > { %v481_v50 = vpop.permute.xlu1 %480 }
  0xfb   : > { %v670_v51 = vpop.permute.xlu2 %669  ;;  %500 = vst.msk [vmem:[#allocation3 + $0x28] sm:$0xff] %vm494_vm4, %v481_v50 }
  0xfc   : > { %v621_v52 = vpop.permute.xlu0 %620  ;;  %549 = vst.msk [vmem:[#allocation3 + $0x28] sm:$0xff] %vm543_vm5, %v530_v44 }
  0xfd   : > { %644 = vst.msk [vmem:[#allocation3 + $0x8] sm:$0xff] %vm642_vm7, %v621_v52 }
  0xfe   : > { %693 = vst.msk [vmem:[#allocation3 + $0x8] sm:$0xff] %vm691_vm9, %v670_v51 }
 0x102   : > { %v428_v53 = vpop.permute.xlu1 %427 }
 0x103   : > { %v629_v54 = vpop.permute.xlu2 %628  ;;  %449 = vst.msk [vmem:[#allocation3 + $0x18] sm:$0xff] %vm445_vm3, %v428_v53 }
 0x104   : > { %v477_v55 = vpop.permute.xlu0 %476 }
 0x105   : > { %498 = vst.msk [vmem:[#allocation3 + $0x18] sm:$0xff] %vm494_vm4, %v477_v55 }
 0x10a   : > { %v729_v56 = vpop.permute.xlu1 %728 }
 0x10b   : > { %v575_v57 = vpop.permute.xlu2 %574  ;;  %747 = vst.msk [vmem:[#allocation3 + $0x30] sm:$0xff] %vm740_vm10, %v729_v56 }
 0x10c   : > { %v436_v58 = vpop.permute.xlu0 %435 }
 0x10d   : > { %453 = vst.msk [vmem:[#allocation3 + $0x38] sm:$0xff] %vm445_vm3, %v436_v58 }
 0x112   : > { %v579_v59 = vpop.permute.xlu1 %578  ;;  %v755_v60 = vld [vmem:[#allocation3 + $0x30] sm:$0xff] }
 0x113   : > { %v625_v61 = vpop.permute.xlu2 %624  ;;  %598 = vst.msk [vmem:[#allocation3 + $0x28] sm:$0xff] %vm592_vm6, %v579_v59  ;;  %1014 = vmatmul.msk.f32.vlgmr.msra.gmra.mxu3 %vm762_vm11, %v755_v60 }
 0x114   : > { %v719_v62 = vpop.permute.xlu0 %718  ;;  %648 = vst.msk [vmem:[#allocation3 + $0x28] sm:$0xff] %vm642_vm7, %v629_v54 }
 0x115   : > { %742 = vst.msk [vmem:[#allocation3 + $0x8] sm:$0xff] %vm740_vm10, %v719_v62 }
 0x11a   : > { %v526_v63 = vpop.permute.xlu1 %525 }
 0x11b   : > { %547 = vst.msk [vmem:[#allocation3 + $0x18] sm:$0xff] %vm543_vm5, %v526_v63  ;;  %v674_v2 = vpop.permute.xlu2 %673 }
 0x11c   : > { %v750_v0 = vld [vmem:[#allocation3 + $0x8] sm:$0xff]  ;;  %v678_v1 = vpop.permute.xlu0 %677  ;;  %596 = vst.msk [vmem:[#allocation3 + $0x18] sm:$0xff] %vm592_vm6, %v575_v57 }
 0x11d   : > { %1009 = vmatmul.msk.f32.gmra.mxu0 %vm762_vm11, %v750_v0  ;;  %697 = vst.msk [vmem:[#allocation3 + $0x28] sm:$0xff] %vm691_vm9, %v678_v1 }
 0x11e   : > { %646 = vst.msk [vmem:[#allocation3 + $0x18] sm:$0xff] %vm642_vm7, %v625_v61 }
 0x11f   : > { %695 = vst.msk [vmem:[#allocation3 + $0x18] sm:$0xff] %vm691_vm9, %v674_v2 }
 0x122   : > { %v485_v3 = vpop.permute.xlu1 %484 }
 0x123   : > { %502 = vst.msk [vmem:[#allocation3 + $0x38] sm:$0xff] %vm494_vm4, %v485_v3  ;;  %v682_v9 = vpop.permute.xlu2 %681 }
 0x124   : > { %v727_v4 = vpop.permute.xlu0 %726 }
 0x125   : > { %746 = vst.msk [vmem:[#allocation3 + $0x28] sm:$0xff] %vm740_vm10, %v727_v4 }
 0x12a   : > { %v534_v5 = vpop.permute.xlu1 %533 }
 0x12b   : > { %551 = vst.msk [vmem:[#allocation3 + $0x38] sm:$0xff] %vm543_vm5, %v534_v5 }
 0x12c   : > { %v633_v6 = vpop.permute.xlu0 %632  ;;  %v754_v7 = vld [vmem:[#allocation3 + $0x28] sm:$0xff] }
 0x12d   : > { %1013 = vmatmul.msk.f32.gmra.mxu2 %vm762_vm11, %v754_v7 }
 0x132   : > { %v583_v8 = vpop.permute.xlu1 %582 }
 0x133   : > { %600 = vst.msk [vmem:[#allocation3 + $0x38] sm:$0xff] %vm592_vm6, %v583_v8 }
 0x134   : > { %v731_v10 = vpop.permute.xlu0 %730  ;;  %650 = vst.msk [vmem:[#allocation3 + $0x38] sm:$0xff] %vm642_vm7, %v633_v6 }
 0x135   : > { %699 = vst.msk [vmem:[#allocation3 + $0x38] sm:$0xff] %vm691_vm9, %v682_v9 }
 0x136   : > { %748 = vst.msk [vmem:[#allocation3 + $0x38] sm:$0xff] %vm740_vm10, %v731_v10 }
 0x13a   : > { %v723_v11 = vpop.permute.xlu1 %722 }
 0x13b   : > { %744 = vst.msk [vmem:[#allocation3 + $0x18] sm:$0xff] %vm740_vm10, %v723_v11 }
 0x13d   : > { %v756_v12 = vld [vmem:[#allocation3 + $0x38] sm:$0xff] }
 0x13e   : > { %1015 = vmatmul.msk.f32.gmra.mxu3 %vm762_vm11, %v756_v12 }
 0x142   : > { %v752_v13 = vld [vmem:[#allocation3 + $0x18] sm:$0xff] }
 0x143   : > { %1011 = vmatmul.msk.f32.gmra.mxu1 %vm762_vm11, %v752_v13 }
 0x150   : > { %v808_v14 = vpop.f32.mrf.mxu0 }
 0x151   : > { %832 = vst.msk [vmem:[%s1432_s30] sm:$0xff] %vm309_vm0, %v808_v14  ;;  %v863_v21 = vmul.f32 %v808_v14, %v808_v14  ;;  %v840_v23 = vsel %vm309_vm0, %v808_v14, 0.0 }
 0x153   : > { %v871_v26 = vsel %vm309_vm0, %v863_v21, 0.0 }
 0x160   : > { %v820_v15 = vpop.f32.mrf.mxu2 }
 0x161   : > { %836 = vst.msk [vmem:[%s1432_s30 + $0x20] sm:$0xff] %vm309_vm0, %v820_v15  ;;  %v867_v32 = vmul.f32 %v820_v15, %v820_v15  ;;  %v847_v39 = vsel %vm309_vm0, %v820_v15, 0.0 }
 0x163   : > { %v878_v44 = vsel %vm309_vm0, %v867_v32, 0.0 }
 0x171   : > { %v814_v16 = vpop.f32.mrf.mxu1 }
 0x172   : > { %834 = vst.msk [vmem:[%s1432_s30 + $0x10] sm:$0xff] %vm309_vm0, %v814_v16  ;;  %v865_v27 = vmul.f32 %v814_v16, %v814_v16  ;;  %v843_v29 = vsel %vm309_vm0, %v814_v16, 0.0 }
 0x174   : > { %v874_v33 = vsel %vm309_vm0, %v865_v27, 0.0 }
 0x196   : > { %v826_v17 = vpop.f32.mrf.mxu3 }
 0x197   : > { %838 = vst.msk [vmem:[%s1432_s30 + $0x30] sm:$0xff] %vm309_vm0, %v826_v17  ;;  %v869_v45 = vmul.f32 %v826_v17, %v826_v17  ;;  %v851_v50 = vsel %vm309_vm0, %v826_v17, 0.0 }
 0x199   : > { %v882_v55 = vsel %vm309_vm0, %v869_v45, 0.0 }
 0x19a   : > { %v811_v18 = vpop.f32.mrf.mxu0 }
 0x19b   : > { %833 = vst.msk [vmem:[%s1432_s30 + $0x8] sm:$0xff] %vm309_vm0, %v811_v18  ;;  %v864_v20 = vmul.f32 %v811_v18, %v811_v18  ;;  %v841_v22 = vsel %vm309_vm0, %v811_v18, 0.0 }
 0x19c   : > { %v842_v25 = vadd.f32 %v841_v22, %v840_v23 }
 0x19d   : > { %v872_v24 = vsel %vm309_vm0, %v864_v20, 0.0 }
 0x19e   : > { %v873_v28 = vadd.f32 %v872_v24, %v871_v26  ;;  %v844_v31 = vadd.f32 %v843_v29, %v842_v25 }
 0x1a0   : > { %v875_v38 = vadd.f32 %v874_v33, %v873_v28 }
 0x1b0   : > { %v823_v19 = vpop.f32.mrf.mxu2 }
 0x1b1   : > { %837 = vst.msk [vmem:[%s1432_s30 + $0x28] sm:$0xff] %vm309_vm0, %v823_v19  ;;  %v868_v40 = vmul.f32 %v823_v19, %v823_v19  ;;  %v849_v46 = vsel %vm309_vm0, %v823_v19, 0.0 }
 0x1b3   : > { %v880_v51 = vsel %vm309_vm0, %v868_v40, 0.0 }
 0x1c0   : > { %v817_v30 = vpop.f32.mrf.mxu1 }
 0x1c1   : > { %835 = vst.msk [vmem:[%s1432_s30 + $0x18] sm:$0xff] %vm309_vm0, %v817_v30  ;;  %v845_v34 = vsel %vm309_vm0, %v817_v30, 0.0  ;;  %v866_v35 = vmul.f32 %v817_v30, %v817_v30  ;;  %v829_v36 = vpop.f32.mrf.mxu3 }
 0x1c2   : > { %v846_v37 = vadd.f32 %v845_v34, %v844_v31  ;;  %839 = vst.msk [vmem:[%s1432_s30 + $0x38] sm:$0xff] %vm309_vm0, %v829_v36  ;;  %v870_v47 = vmul.f32 %v829_v36, %v829_v36  ;;  %v853_v52 = vsel %vm309_vm0, %v829_v36, 0.0 }
 0x1c3   : > { %v876_v41 = vsel %vm309_vm0, %v866_v35, 0.0 }
 0x1c4   : > { %v848_v42 = vadd.f32 %v847_v39, %v846_v37  ;;  %v877_v43 = vadd.f32 %v876_v41, %v875_v38  ;;  %v884_v56 = vsel %vm309_vm0, %v870_v47, 0.0 }
 0x1c6   : > { %v879_v48 = vadd.f32 %v878_v44, %v877_v43  ;;  %v850_v49 = vadd.f32 %v849_v46, %v848_v42 }
 0x1c8   : > { %v852_v53 = vadd.f32 %v851_v50, %v850_v49  ;;  %v881_v54 = vadd.f32 %v880_v51, %v879_v48 }
 0x1ca   : > { %v854_v57 = vadd.f32 %v853_v52, %v852_v53  ;;  %v883_v58 = vadd.f32 %v882_v55, %v881_v54 }
 0x1cc   : > { %v855_v59 = vrot.slane %v854_v57, 4  ;;  %v885_v60 = vadd.f32 %v884_v56, %v883_v58 }
 0x1ce   : > { %v856_v61 = vadd.f32 %v855_v59, %v854_v57  ;;  %v886_v62 = vrot.slane %v885_v60, 4 }
 0x1d0   : > { %v857_v63 = vrot.slane %v856_v61, 2  ;;  %v887_v0 = vadd.f32 %v886_v62, %v885_v60 }
 0x1d2   : > { %v858_v1 = vadd.f32 %v857_v63, %v856_v61  ;;  %v888_v2 = vrot.slane %v887_v0, 2 }
 0x1d4   : > { %v859_v3 = vrot.slane %v858_v1, 1  ;;  %v889_v4 = vadd.f32 %v888_v2, %v887_v0 }
 0x1d6   : > { %v860_v5 = vadd.f32 %v859_v3, %v858_v1  ;;  %v890_v6 = vrot.slane %v889_v4, 1 }
 0x1d8   : > { %862 = vst.msk [vmem:[%s265_s8] sm:$0x1] %vm861_vm12, %v860_v5  ;;  %v891_v7 = vadd.f32 %v890_v6, %v889_v4 }
 0x1da   : > { %892 = vst.msk [vmem:[%s268_s11] sm:$0x1] %vm861_vm12, %v891_v7 }
 0x1db PF: > { %s17_s21 = sadd.s32 1, %s1060_s21  }
 0x1dc   : > { %p14_p4 = scmp.ge.s32.totalorder %s17_s21, 4  }
 0x1de   :  { %16 = sbr.rel (!%p14_p4) target bundleno = 1 (0x1), region = 92 }

</bundles_post_ra>
